<compile_context>
chip_gen: v7x
topology: tpu7x:2x2x1
jax: 0.10.0
libtpu: 0.0.40
codegen_flags: <defaults>
</compile_context>

<pallas_src>
import functools
from typing import NamedTuple

import jax
import jax.numpy as jnp
from jax.experimental import pallas as pl
from jax.experimental.pallas import tpu as pltpu


def _round_up(x, m):
    return ((x + m - 1) // m) * m


# ---------------------------------------------------------------------------
# Kernel body
# ---------------------------------------------------------------------------
def _fused_mlp_kernel(*refs, n_layers):
    # refs = (x_ref, w0, b0, w1, b1, ..., w_{L-1}, b_{L-1}, alpha_ref, o_ref)
    x_ref = refs[0]
    alpha_ref = refs[1 + 2 * n_layers]       # (1, 1) f32 in SMEM
    o_ref = refs[2 + 2 * n_layers]

    alpha = alpha_ref[0, 0]
    h = x_ref[...]                           # (tm, F0p) bf16 — streamed tile
    for i in range(n_layers):                # static Python unroll over layers
        w = refs[1 + 2 * i][...]             # (Fin_p, Fout_p) bf16, resident
        b = refs[2 + 2 * i][...]             # (1, Fout_p)     f32, resident
        y = jnp.dot(h, w, preferred_element_type=jnp.float32) + b
        if i < n_layers - 1:
            # PReLU with the single shared alpha (nn.PReLU() default).
            # TODO(synk): if the torch module used num_parameters=channels,
            # alpha must become a per-layer (1, Fout_p) VMEM vector.
            y = jnp.where(y >= 0.0, y, alpha * y)
            # TODO(synk): training-mode dropout (pltpu.prng_* mask + 1/(1-p)
            # scale) omitted; this implements eval-mode semantics (identity).
            y = y.astype(jnp.bfloat16)       # next layer's MXU operand
        h = y
    o_ref[...] = h.astype(o_ref.dtype)       # lane-dense, 128-padded store


# ---------------------------------------------------------------------------
# One-time parameter / feature preparation (hoisted out of the forward call)
# ---------------------------------------------------------------------------
class PreparedFFN(NamedTuple):
    weights: tuple   # per layer: (Fin_p, Fout_p) bf16, zero-padded
    biases: tuple    # per layer: (1, Fout_p) f32, zero-padded
    alpha: jnp.ndarray  # (1, 1) f32
    dims: tuple      # logical dims [in_feats, hidden, ..., out_feats]
    pdims: tuple     # 128-padded dims


def prepare_ffn_params(params, prelu_alpha):
    """Pad + cast weights/biases once (call at init, not per forward)."""
    dims = [params[0][0].shape[0]] + [w.shape[1] for (w, _) in params]
    # 128-alignment: optimal for v5e's 128x128 MXU; this kernel is HBM-bound
    # at SIGN-MLP sizes so we do not pad further to 256 for v6e/v7x.
    pdims = [_round_up(d, 128) for d in dims]
    ws, bs = [], []
    for li, (w, b) in enumerate(params):
        fin, fout = w.shape
        wp = (jnp.zeros((pdims[li], pdims[li + 1]), jnp.float32)
              .at[:fin, :fout].set(w)).astype(jnp.bfloat16)
        # TODO(synk): on v5e/v6e, int8 per-channel-quantized weights would
        # halve the resident footprint again (v7x MXU has no int8 path).
        bp = jnp.zeros((1, pdims[li + 1]), jnp.float32).at[0, :fout].set(b)
        ws.append(wp)
        bs.append(bp)
    alpha = jnp.asarray(prelu_alpha, jnp.float32).reshape(1, 1)
    return PreparedFFN(tuple(ws), tuple(bs), alpha, tuple(dims), tuple(pdims))


def prepare_features(x, in_pdim):
    """Cast x to bf16 and pad the feature dim to the 128-aligned width.

    No row padding is performed (the kernel handles the ragged last row
    block). Ideally called once if x is reused across many forward calls.
    """
    x = x.astype(jnp.bfloat16)
    n, f = x.shape
    if f != in_pdim:
        x = jnp.zeros((n, in_pdim), jnp.bfloat16).at[:, :f].set(x)
    return x


# ---------------------------------------------------------------------------
# VMEM-aware tiling
# ---------------------------------------------------------------------------
_VMEM_BUDGET = 48 * 1024 * 1024  # conservative: fits v7x's 64 MiB with headroom


def _tile_vmem_bytes(tm, pdims):
    return (2 * tm * pdims[0] * 2        # bf16 x tiles, double-buffered
            + 2 * tm * pdims[-1] * 4     # f32 out tiles, double-buffered
            + 2 * tm * max(pdims) * 4)   # in-kernel activation temporaries


def _resident_bytes(pdims, single_buffer):
    bc = 1 if single_buffer else 2
    wbytes = sum(pdims[i] * pdims[i + 1] * 2 for i in range(len(pdims) - 1))
    bbytes = sum(pdims[i + 1] * 4 for i in range(len(pdims) - 1))
    return bc * (wbytes + bbytes)


def _choose_row_tile(n_rows, pdims, resident_bytes):
    """Largest row tile that fits the VMEM budget AND leaves >= 8 grid steps
    (v7x megacore load balance); falls back to 128 for small N."""
    for cand in (1024, 512, 256):
        fits = resident_bytes + _tile_vmem_bytes(cand, pdims) <= _VMEM_BUDGET
        if fits and pl.cdiv(n_rows, cand) >= 8:
            return cand
    return 128
    # TODO(synk): if resident weights alone exceed the budget (very large
    # hidden dims, esp. on v7x's 64 MiB VMEM), fall back to per-layer
    # pallas_calls / K-tiled matmuls instead of the all-resident fusion.


# ---------------------------------------------------------------------------
# Forward
# ---------------------------------------------------------------------------
def _forward(x, prepared, *, single_buffer_weights):
    n_rows = x.shape[0]
    pdims = prepared.pdims
    n_layers = len(prepared.weights)

    resident_bytes = _resident_bytes(pdims, single_buffer_weights)
    tm = _choose_row_tile(n_rows, pdims, resident_bytes)
    grid = (pl.cdiv(n_rows, tm),)  # ragged last block handled by Pallas masks

    def _const_spec(shape):
        # Grid-invariant (fetched once); single buffer halves VMEM footprint.
        if single_buffer_weights:
            return pl.BlockSpec(shape, lambda i: (0, 0),
                                pipeline_mode=pl.Buffered(1))
        return pl.BlockSpec(shape, lambda i: (0, 0))

    flat_inputs = [x]
    in_specs = [pl.BlockSpec((tm, pdims[0]), lambda i: (i, 0))]
    for li in range(n_layers):
        flat_inputs.extend([prepared.weights[li], prepared.biases[li]])
        in_specs.append(_const_spec((pdims[li], pdims[li + 1])))
        in_specs.append(_const_spec((1, pdims[li + 1])))
    flat_inputs.append(prepared.alpha)
    in_specs.append(pl.BlockSpec((1, 1), lambda i: (0, 0),
                                 memory_space=pltpu.SMEM))

    out_spec = pl.BlockSpec((tm, pdims[-1]), lambda i: (i, 0))

    flops = sum(2 * n_rows * pdims[li] * pdims[li + 1]
                for li in range(n_layers))
    bytes_accessed = (x.size * x.dtype.itemsize
                      + sum(a.size * a.dtype.itemsize for a in flat_inputs[1:])
                      + n_rows * pdims[-1] * 4)
    cost = pl.CostEstimate(flops=flops, transcendentals=0,
                           bytes_accessed=bytes_accessed)

    # Explicit scoped-VMEM limit sized from the actual requirement (+ slack),
    # capped at 64 MiB so it is valid on every generation (v7x physical cap).
    vmem_limit = int(min(64 << 20,
                         max(32 << 20,
                             resident_bytes + _tile_vmem_bytes(tm, pdims)
                             + (4 << 20))))

    kernel = functools.partial(_fused_mlp_kernel, n_layers=n_layers)
    # Output stays f32 to match the torch module; TODO(synk): optionally emit
    # bf16 (and cast outside) to halve writeback bytes on v5e.
    out_p = pl.pallas_call(
        kernel,
        out_shape=jax.ShapeDtypeStruct((n_rows, pdims[-1]), jnp.float32),
        grid_spec=pltpu.PrefetchScalarGridSpec(
            num_scalar_prefetch=0,
            grid=grid,
            in_specs=in_specs,
            out_specs=out_spec,
        ),
        compiler_params=pltpu.CompilerParams(
            dimension_semantics=("parallel",),
            vmem_limit_bytes=vmem_limit),
        cost_estimate=cost,
    )(*flat_inputs)
    return out_p[:, :prepared.dims[-1]]


def feed_forward_net(x, prepared):
    """Fused SIGN FeedForwardNet forward. x: (N, in_feats); returns
    (N, out_feats) f32. `prepared` comes from prepare_ffn_params (once)."""
    if x.dtype != jnp.bfloat16 or x.shape[1] != prepared.pdims[0]:
        x = prepare_features(x, prepared.pdims[0])
    try:
        return _forward(x, prepared, single_buffer_weights=True)
    except Exception:
        # Defensive fallback for jax versions where pl.Buffered(1)
        # single-buffering of grid-invariant inputs is not supported.
        # Semantics are identical; only the weight VMEM footprint differs.
        return _forward(x, prepared, single_buffer_weights=False)


# ---------------------------------------------------------------------------
# Init matching the torch module's reset_parameters()
# ---------------------------------------------------------------------------
def xavier_uniform(key, fan_in, fan_out, gain):
    # Matches torch.nn.init.xavier_uniform_ on a (fan_out, fan_in) weight;
    # we directly build the transposed (fan_in, fan_out) layout.
    bound = gain * jnp.sqrt(6.0 / (fan_in + fan_out))
    return jax.random.uniform(key, (fan_in, fan_out), jnp.float32,
                              minval=-bound, maxval=bound)


def init_ffn_params(key, in_feats, hidden, out_feats, n_layers):
    gain = jnp.sqrt(2.0)  # nn.init.calculate_gain('relu')
    if n_layers == 1:
        dims = [(in_feats, out_feats)]
    else:
        dims = [(in_feats, hidden)]
        dims += [(hidden, hidden)] * (n_layers - 2)
        dims += [(hidden, out_feats)]
    params = []
    for (fi, fo) in dims:
        key, sub = jax.random.split(key)
        w = xavier_uniform(sub, fi, fo, gain)
        b = jnp.zeros((fo,), jnp.float32)
        params.append((w, b))
    prelu_alpha = jnp.float32(0.25)  # nn.PReLU() default
    return params, prelu_alpha


if __name__ == "__main__":
    key = jax.random.PRNGKey(0)
    in_feats, hidden, out_feats, n_layers = 64, 128, 32, 3
    # N deliberately NOT a multiple of the 128-row tile: exercises the masked
    # last row block (no wrapper-side row-padding copy anymore).
    N = 250

    pkey, xkey = jax.random.split(key)
    params, alpha = init_ffn_params(pkey, in_feats, hidden, out_feats,
                                    n_layers)
    x = jax.random.normal(xkey, (N, in_feats), jnp.float32)

    # One-time parameter preparation (model init), not per forward call.
    prepared = prepare_ffn_params(params, alpha)

    out = feed_forward_net(x, prepared)
    out = jax.block_until_ready(out)
    assert out.shape == (N, out_feats)

    # Primary correctness gate: matched-precision reference (bf16 MXU
    # operands, f32 accumulation) — mirrors the kernel's arithmetic exactly.
    refm = x.astype(jnp.bfloat16)
    for i, (w, b) in enumerate(params):
        refm = jnp.dot(refm, w.astype(jnp.bfloat16),
                       preferred_element_type=jnp.float32) + b
        if i < n_layers - 1:
            refm = jnp.where(refm >= 0, refm, alpha * refm).astype(jnp.bfloat16)
    assert jnp.allclose(out, refm, atol=1e-3, rtol=1e-3), (
        float(jnp.max(jnp.abs(out - refm))))

    # Secondary check vs the full-f32 PyTorch semantics (loose tolerance
    # covers the bf16 operand rounding; eval-mode dropout = identity).
    ref32 = x
    for i, (w, b) in enumerate(params):
        ref32 = ref32 @ w + b
        if i < n_layers - 1:
            ref32 = jnp.where(ref32 >= 0, ref32, alpha * ref32)
    assert jnp.allclose(out, ref32, atol=1e-1, rtol=1e-1), (
        float(jnp.max(jnp.abs(out - ref32))))

    print("KERNEL_OK")
</pallas_src>

<mosaic_0001>
module attributes {stable_mosaic.version = 11 : i64} {
  func.func @_fused_mlp_kernel(%arg0: i32, %arg1: memref<128x128xbf16, #tpu.memory_space<vmem>>, %arg2: memref<128x128xbf16, #tpu.memory_space<vmem>>, %arg3: memref<1x128xf32, #tpu.memory_space<vmem>>, %arg4: memref<128x128xbf16, #tpu.memory_space<vmem>>, %arg5: memref<1x128xf32, #tpu.memory_space<vmem>>, %arg6: memref<128x128xbf16, #tpu.memory_space<vmem>>, %arg7: memref<1x128xf32, #tpu.memory_space<vmem>>, %arg8: memref<1x1xf32, #tpu.memory_space<smem>>, %arg9: memref<128x128xf32, #tpu.memory_space<vmem>>) attributes {dimension_semantics = [#tpu.dimension_semantics<parallel>], iteration_bounds = array<i64: 2>, scalar_prefetch = 0 : i64, scratch_operands = 0 : i64, tpu.core_type = #tpu.core_type<tc>, window_params = [{transform_indices = @transform_0, window_bounds = array<i64: 128, 128>}, {pipeline_mode = #tpu.pipeline_mode<synchronous>, transform_indices = @transform_1, window_bounds = array<i64: 128, 128>}, {pipeline_mode = #tpu.pipeline_mode<synchronous>, transform_indices = @transform_2, window_bounds = array<i64: 1, 128>}, {pipeline_mode = #tpu.pipeline_mode<synchronous>, transform_indices = @transform_3, window_bounds = array<i64: 128, 128>}, {pipeline_mode = #tpu.pipeline_mode<synchronous>, transform_indices = @transform_4, window_bounds = array<i64: 1, 128>}, {pipeline_mode = #tpu.pipeline_mode<synchronous>, transform_indices = @transform_5, window_bounds = array<i64: 128, 128>}, {pipeline_mode = #tpu.pipeline_mode<synchronous>, transform_indices = @transform_6, window_bounds = array<i64: 1, 128>}, {transform_indices = @transform_7, window_bounds = array<i64: 1, 1>}, {transform_indices = @transform_8, window_bounds = array<i64: 128, 128>}]} {
    %c0 = arith.constant 0 : index
    %c0_0 = arith.constant 0 : index
    %0 = memref.load %arg8[%c0, %c0_0] : memref<1x1xf32, #tpu.memory_space<smem>>
    %c0_1 = arith.constant 0 : index
    %c0_2 = arith.constant 0 : index
    %1 = vector.load %arg1[%c0_1, %c0_2] : memref<128x128xbf16, #tpu.memory_space<vmem>>, vector<128x128xbf16>
    %c0_3 = arith.constant 0 : index
    %c0_4 = arith.constant 0 : index
    %2 = vector.load %arg2[%c0_3, %c0_4] : memref<128x128xbf16, #tpu.memory_space<vmem>>, vector<128x128xbf16>
    %c0_5 = arith.constant 0 : index
    %c0_6 = arith.constant 0 : index
    %3 = vector.load %arg3[%c0_5, %c0_6] : memref<1x128xf32, #tpu.memory_space<vmem>>, vector<1x128xf32>
    %cst = arith.constant dense<0.000000e+00> : vector<128x128xf32>
    %4 = tpu.matmul %1, %2, %cst {dimension_numbers = #tpu.dot_dimension_numbers<[1], [0], [0], [1], [0, 0, 1, 1], [], []>} : vector<128x128xbf16>, vector<128x128xbf16>, vector<128x128xf32> -> vector<128x128xf32>
    %5 = vector.broadcast %3 : vector<1x128xf32> to vector<128x128xf32>
    %6 = arith.addf %4, %5 : vector<128x128xf32>
    %cst_7 = arith.constant 0.000000e+00 : f32
    %7 = vector.broadcast %cst_7 : f32 to vector<128x128xf32>
    %8 = arith.cmpf oge, %6, %7 : vector<128x128xf32>
    %9 = vector.broadcast %0 : f32 to vector<128x128xf32>
    %10 = arith.mulf %9, %6 : vector<128x128xf32>
    %11 = arith.select %8, %6, %10 : vector<128x128xi1>, vector<128x128xf32>
    %12 = arith.truncf %11 : vector<128x128xf32> to vector<128x128xbf16>
    %c0_8 = arith.constant 0 : index
    %c0_9 = arith.constant 0 : index
    %13 = vector.load %arg4[%c0_8, %c0_9] : memref<128x128xbf16, #tpu.memory_space<vmem>>, vector<128x128xbf16>
    %c0_10 = arith.constant 0 : index
    %c0_11 = arith.constant 0 : index
    %14 = vector.load %arg5[%c0_10, %c0_11] : memref<1x128xf32, #tpu.memory_space<vmem>>, vector<1x128xf32>
    %cst_12 = arith.constant dense<0.000000e+00> : vector<128x128xf32>
    %15 = tpu.matmul %12, %13, %cst_12 {dimension_numbers = #tpu.dot_dimension_numbers<[1], [0], [0], [1], [0, 0, 1, 1], [], []>} : vector<128x128xbf16>, vector<128x128xbf16>, vector<128x128xf32> -> vector<128x128xf32>
    %16 = vector.broadcast %14 : vector<1x128xf32> to vector<128x128xf32>
    %17 = arith.addf %15, %16 : vector<128x128xf32>
    %cst_13 = arith.constant 0.000000e+00 : f32
    %18 = vector.broadcast %cst_13 : f32 to vector<128x128xf32>
    %19 = arith.cmpf oge, %17, %18 : vector<128x128xf32>
    %20 = vector.broadcast %0 : f32 to vector<128x128xf32>
    %21 = arith.mulf %20, %17 : vector<128x128xf32>
    %22 = arith.select %19, %17, %21 : vector<128x128xi1>, vector<128x128xf32>
    %23 = arith.truncf %22 : vector<128x128xf32> to vector<128x128xbf16>
    %c0_14 = arith.constant 0 : index
    %c0_15 = arith.constant 0 : index
    %24 = vector.load %arg6[%c0_14, %c0_15] : memref<128x128xbf16, #tpu.memory_space<vmem>>, vector<128x128xbf16>
    %c0_16 = arith.constant 0 : index
    %c0_17 = arith.constant 0 : index
    %25 = vector.load %arg7[%c0_16, %c0_17] : memref<1x128xf32, #tpu.memory_space<vmem>>, vector<1x128xf32>
    %cst_18 = arith.constant dense<0.000000e+00> : vector<128x128xf32>
    %26 = tpu.matmul %23, %24, %cst_18 {dimension_numbers = #tpu.dot_dimension_numbers<[1], [0], [0], [1], [0, 0, 1, 1], [], []>} : vector<128x128xbf16>, vector<128x128xbf16>, vector<128x128xf32> -> vector<128x128xf32>
    %27 = vector.broadcast %25 : vector<1x128xf32> to vector<128x128xf32>
    %28 = arith.addf %26, %27 : vector<128x128xf32>
    %c0_19 = arith.constant 0 : index
    %c0_20 = arith.constant 0 : index
    %29 = vector.load %arg9[%c0_19, %c0_20] : memref<128x128xf32, #tpu.memory_space<vmem>>, vector<128x128xf32>
    tpu.vector_store %arg9[%c0_19, %c0_20], %28 {strides = array<i32>} : memref<128x128xf32, #tpu.memory_space<vmem>>, vector<128x128xf32>,
    return
  }
  func.func @transform_0(%arg0: i32) -> (i32, i32) {
    %c0_i32 = arith.constant 0 : i32
    %c0_i32_0 = arith.constant 0 : i32
    return %arg0, %c0_i32 : i32, i32
  }
  func.func @transform_1(%arg0: i32) -> (i32, i32) {
    %c0_i32 = arith.constant 0 : i32
    %c0_i32_0 = arith.constant 0 : i32
    %c0_i32_1 = arith.constant 0 : i32
    return %c0_i32, %c0_i32_0 : i32, i32
  }
  func.func @transform_2(%arg0: i32) -> (i32, i32) {
    %c0_i32 = arith.constant 0 : i32
    %c0_i32_0 = arith.constant 0 : i32
    %c0_i32_1 = arith.constant 0 : i32
    return %c0_i32, %c0_i32_0 : i32, i32
  }
  func.func @transform_3(%arg0: i32) -> (i32, i32) {
    %c0_i32 = arith.constant 0 : i32
    %c0_i32_0 = arith.constant 0 : i32
    %c0_i32_1 = arith.constant 0 : i32
    return %c0_i32, %c0_i32_0 : i32, i32
  }
  func.func @transform_4(%arg0: i32) -> (i32, i32) {
    %c0_i32 = arith.constant 0 : i32
    %c0_i32_0 = arith.constant 0 : i32
    %c0_i32_1 = arith.constant 0 : i32
    return %c0_i32, %c0_i32_0 : i32, i32
  }
  func.func @transform_5(%arg0: i32) -> (i32, i32) {
    %c0_i32 = arith.constant 0 : i32
    %c0_i32_0 = arith.constant 0 : i32
    %c0_i32_1 = arith.constant 0 : i32
    return %c0_i32, %c0_i32_0 : i32, i32
  }
  func.func @transform_6(%arg0: i32) -> (i32, i32) {
    %c0_i32 = arith.constant 0 : i32
    %c0_i32_0 = arith.constant 0 : i32
    %c0_i32_1 = arith.constant 0 : i32
    return %c0_i32, %c0_i32_0 : i32, i32
  }
  func.func @transform_7(%arg0: i32) -> (i32, i32) {
    %c0_i32 = arith.constant 0 : i32
    %c0_i32_0 = arith.constant 0 : i32
    %c0_i32_1 = arith.constant 0 : i32
    return %c0_i32, %c0_i32_0 : i32, i32
  }
  func.func @transform_8(%arg0: i32) -> (i32, i32) {
    %c0_i32 = arith.constant 0 : i32
    %c0_i32_0 = arith.constant 0 : i32
    return %arg0, %c0_i32 : i32, i32
  }
}

module attributes {stable_mosaic.version = 11 : i64} {
  func.func @_fused_mlp_kernel(%arg0: i32, %arg1: memref<128x128xbf16, #tpu.memory_space<vmem>>, %arg2: memref<128x128xbf16, #tpu.memory_space<vmem>>, %arg3: memref<1x128xf32, #tpu.memory_space<vmem>>, %arg4: memref<128x128xbf16, #tpu.memory_space<vmem>>, %arg5: memref<1x128xf32, #tpu.memory_space<vmem>>, %arg6: memref<128x128xbf16, #tpu.memory_space<vmem>>, %arg7: memref<1x128xf32, #tpu.memory_space<vmem>>, %arg8: memref<1x1xf32, #tpu.memory_space<smem>>, %arg9: memref<128x128xf32, #tpu.memory_space<vmem>>) attributes {dimension_semantics = [#tpu.dimension_semantics<parallel>], iteration_bounds = array<i64: 2>, scalar_prefetch = 0 : i64, scratch_operands = 0 : i64, tpu.core_type = #tpu.core_type<tc>, window_params = [{transform_indices = @transform_0, window_bounds = array<i64: 128, 128>}, {pipeline_mode = #tpu.pipeline_mode<synchronous>, transform_indices = @transform_1, window_bounds = array<i64: 128, 128>}, {pipeline_mode = #tpu.pipeline_mode<synchronous>, transform_indices = @transform_2, window_bounds = array<i64: 1, 128>}, {pipeline_mode = #tpu.pipeline_mode<synchronous>, transform_indices = @transform_3, window_bounds = array<i64: 128, 128>}, {pipeline_mode = #tpu.pipeline_mode<synchronous>, transform_indices = @transform_4, window_bounds = array<i64: 1, 128>}, {pipeline_mode = #tpu.pipeline_mode<synchronous>, transform_indices = @transform_5, window_bounds = array<i64: 128, 128>}, {pipeline_mode = #tpu.pipeline_mode<synchronous>, transform_indices = @transform_6, window_bounds = array<i64: 1, 128>}, {transform_indices = @transform_7, window_bounds = array<i64: 1, 1>}, {transform_indices = @transform_8, window_bounds = array<i64: 128, 128>}]} {
    %c0 = arith.constant 0 : index
    %c0_0 = arith.constant 0 : index
    %0 = memref.load %arg8[%c0, %c0_0] : memref<1x1xf32, #tpu.memory_space<smem>>
    %c0_1 = arith.constant 0 : index
    %c0_2 = arith.constant 0 : index
    %1 = vector.load %arg1[%c0_1, %c0_2] : memref<128x128xbf16, #tpu.memory_space<vmem>>, vector<128x128xbf16>
    %c0_3 = arith.constant 0 : index
    %c0_4 = arith.constant 0 : index
    %2 = vector.load %arg2[%c0_3, %c0_4] : memref<128x128xbf16, #tpu.memory_space<vmem>>, vector<128x128xbf16>
    %c0_5 = arith.constant 0 : index
    %c0_6 = arith.constant 0 : index
    %3 = vector.load %arg3[%c0_5, %c0_6] : memref<1x128xf32, #tpu.memory_space<vmem>>, vector<1x128xf32>
    %cst = arith.constant dense<0.000000e+00> : vector<128x128xf32>
    %4 = tpu.matmul %1, %2, %cst {dimension_numbers = #tpu.dot_dimension_numbers<[1], [0], [0], [1], [0, 0, 1, 1], [], []>} : vector<128x128xbf16>, vector<128x128xbf16>, vector<128x128xf32> -> vector<128x128xf32>
    %5 = vector.broadcast %3 : vector<1x128xf32> to vector<128x128xf32>
    %6 = arith.addf %4, %5 : vector<128x128xf32>
    %cst_7 = arith.constant 0.000000e+00 : f32
    %7 = vector.broadcast %cst_7 : f32 to vector<128x128xf32>
    %8 = arith.cmpf oge, %6, %7 : vector<128x128xf32>
    %9 = vector.broadcast %0 : f32 to vector<128x128xf32>
    %10 = arith.mulf %9, %6 : vector<128x128xf32>
    %11 = arith.select %8, %6, %10 : vector<128x128xi1>, vector<128x128xf32>
    %12 = arith.truncf %11 : vector<128x128xf32> to vector<128x128xbf16>
    %c0_8 = arith.constant 0 : index
    %c0_9 = arith.constant 0 : index
    %13 = vector.load %arg4[%c0_8, %c0_9] : memref<128x128xbf16, #tpu.memory_space<vmem>>, vector<128x128xbf16>
    %c0_10 = arith.constant 0 : index
    %c0_11 = arith.constant 0 : index
    %14 = vector.load %arg5[%c0_10, %c0_11] : memref<1x128xf32, #tpu.memory_space<vmem>>, vector<1x128xf32>
    %cst_12 = arith.constant dense<0.000000e+00> : vector<128x128xf32>
    %15 = tpu.matmul %12, %13, %cst_12 {dimension_numbers = #tpu.dot_dimension_numbers<[1], [0], [0], [1], [0, 0, 1, 1], [], []>} : vector<128x128xbf16>, vector<128x128xbf16>, vector<128x128xf32> -> vector<128x128xf32>
    %16 = vector.broadcast %14 : vector<1x128xf32> to vector<128x128xf32>
    %17 = arith.addf %15, %16 : vector<128x128xf32>
    %cst_13 = arith.constant 0.000000e+00 : f32
    %18 = vector.broadcast %cst_13 : f32 to vector<128x128xf32>
    %19 = arith.cmpf oge, %17, %18 : vector<128x128xf32>
    %20 = vector.broadcast %0 : f32 to vector<128x128xf32>
    %21 = arith.mulf %20, %17 : vector<128x128xf32>
    %22 = arith.select %19, %17, %21 : vector<128x128xi1>, vector<128x128xf32>
    %23 = arith.truncf %22 : vector<128x128xf32> to vector<128x128xbf16>
    %c0_14 = arith.constant 0 : index
    %c0_15 = arith.constant 0 : index
    %24 = vector.load %arg6[%c0_14, %c0_15] : memref<128x128xbf16, #tpu.memory_space<vmem>>, vector<128x128xbf16>
    %c0_16 = arith.constant 0 : index
    %c0_17 = arith.constant 0 : index
    %25 = vector.load %arg7[%c0_16, %c0_17] : memref<1x128xf32, #tpu.memory_space<vmem>>, vector<1x128xf32>
    %cst_18 = arith.constant dense<0.000000e+00> : vector<128x128xf32>
    %26 = tpu.matmul %23, %24, %cst_18 {dimension_numbers = #tpu.dot_dimension_numbers<[1], [0], [0], [1], [0, 0, 1, 1], [], []>} : vector<128x128xbf16>, vector<128x128xbf16>, vector<128x128xf32> -> vector<128x128xf32>
    %27 = vector.broadcast %25 : vector<1x128xf32> to vector<128x128xf32>
    %28 = arith.addf %26, %27 : vector<128x128xf32>
    %c0_19 = arith.constant 0 : index
    %c0_20 = arith.constant 0 : index
    %29 = vector.load %arg9[%c0_19, %c0_20] : memref<128x128xf32, #tpu.memory_space<vmem>>, vector<128x128xf32>
    tpu.vector_store %arg9[%c0_19, %c0_20], %28 {strides = array<i32>} : memref<128x128xf32, #tpu.memory_space<vmem>>, vector<128x128xf32>,
    return
  }
  func.func @transform_0(%arg0: i32) -> (i32, i32) {
    %c0_i32 = arith.constant 0 : i32
    %c0_i32_0 = arith.constant 0 : i32
    return %arg0, %c0_i32 : i32, i32
  }
  func.func @transform_1(%arg0: i32) -> (i32, i32) {
    %c0_i32 = arith.constant 0 : i32
    %c0_i32_0 = arith.constant 0 : i32
    %c0_i32_1 = arith.constant 0 : i32
    return %c0_i32, %c0_i32_0 : i32, i32
  }
  func.func @transform_2(%arg0: i32) -> (i32, i32) {
    %c0_i32 = arith.constant 0 : i32
    %c0_i32_0 = arith.constant 0 : i32
    %c0_i32_1 = arith.constant 0 : i32
    return %c0_i32, %c0_i32_0 : i32, i32
  }
  func.func @transform_3(%arg0: i32) -> (i32, i32) {
    %c0_i32 = arith.constant 0 : i32
    %c0_i32_0 = arith.constant 0 : i32
    %c0_i32_1 = arith.constant 0 : i32
    return %c0_i32, %c0_i32_0 : i32, i32
  }
  func.func @transform_4(%arg0: i32) -> (i32, i32) {
    %c0_i32 = arith.constant 0 : i32
    %c0_i32_0 = arith.constant 0 : i32
    %c0_i32_1 = arith.constant 0 : i32
    return %c0_i32, %c0_i32_0 : i32, i32
  }
  func.func @transform_5(%arg0: i32) -> (i32, i32) {
    %c0_i32 = arith.constant 0 : i32
    %c0_i32_0 = arith.constant 0 : i32
    %c0_i32_1 = arith.constant 0 : i32
    return %c0_i32, %c0_i32_0 : i32, i32
  }
  func.func @transform_6(%arg0: i32) -> (i32, i32) {
    %c0_i32 = arith.constant 0 : i32
    %c0_i32_0 = arith.constant 0 : i32
    %c0_i32_1 = arith.constant 0 : i32
    return %c0_i32, %c0_i32_0 : i32, i32
  }
  func.func @transform_7(%arg0: i32) -> (i32, i32) {
    %c0_i32 = arith.constant 0 : i32
    %c0_i32_0 = arith.constant 0 : i32
    %c0_i32_1 = arith.constant 0 : i32
    return %c0_i32, %c0_i32_0 : i32, i32
  }
  func.func @transform_8(%arg0: i32) -> (i32, i32) {
    %c0_i32 = arith.constant 0 : i32
    %c0_i32_0 = arith.constant 0 : i32
    return %arg0, %c0_i32 : i32, i32
  }
}

</mosaic_0001>

<bundles_post_ra>
// kernel: tpu_custom_call.1
= control target key start
LH: loop header
LB: loop body
LE: loop exit
PB: predicated region body
PF: predicated region fallthrough
CT: control target
= control target key end

     0   :  { %s2167_s0 = inlined_call_operand.hbm [shape: bf16[250,128], index: 0, kind: input, shape index: {}]   ;;  %s2168_s1 = inlined_call_operand.hbm [shape: bf16[128,128], index: 1, kind: input, shape index: {}]   ;;  %s2169_s2 = inlined_call_operand.vmem [shape: f32[1,128], index: 2, kind: input, shape index: {}]   ;;  %s2170_s3 = inlined_call_operand.hbm [shape: bf16[128,128], index: 3, kind: input, shape index: {}]   ;;  %s2171_s4 = inlined_call_operand.vmem [shape: f32[1,128], index: 4, kind: input, shape index: {}]   ;;  %s2172_s5 = inlined_call_operand.hbm [shape: bf16[128,128], index: 5, kind: input, shape index: {}]   ;;  %s2173_s6 = inlined_call_operand.vmem [shape: f32[1,128], index: 6, kind: input, shape index: {}]   ;;  %s2174_s7 = inlined_call_operand.<no memory space> [shape: f32[1,1], index: 7, kind: input, shape index: {}]   ;;  %s2175_s8 = inlined_call_operand.hbm [shape: f32[250,128], index: 8, kind: output, shape index: {}]  }
   0x1   :  { %13 = sst [smem:[#allocation2]] %s2174_s7 }
   0x2   :  { %14 = vsyncpa [#allocation4], 0 }
   0x3   :  { %16 = vsyncpa [#allocation4 + $0x1], 0 }
   0x4   :  { %17 = vsyncpa [#allocation7], 0 }
   0x5   :  { %18 = vsyncpa [#allocation10], 0 }
   0x6   :  { %19 = vsyncpa [#allocation5], 0 }
   0x7   :  { %21 = vsyncpa [#allocation5 + $0x1], 0  ;;  %s1763_s29 = smov 0   ;;  %s1765_s30 = smov 0  }
   0x8   :  { %s1767_s9 = smov 0   ;;  %s1769_s10 = smov 0  }
   0x9 LB: > { %s1784_s7 = sadd.s32 4294967295, %s1704_s10   ;;  %s1186_s11 = sadd.s32 4294967294, %s1704_s10   ;;  %s1704_s10 = sphi %s1769_s10, %s2201_s10   ;;  %s1700_s9 = sphi %s1767_s9, %s2200_s9   ;;  %s1696_s30 = sphi %s1765_s30, %s2199_s30   ;;  %s1692_s29 = sphi %s1763_s29, %s2198_s29  }
   0xa   : > { %p47_p0 = scmp.ne.s32.totalorder %s1696_s30, %s1692_s29  ;;  %p2176_p1 = scmp.eq.s32.totalorder %s1784_s7, 0 }
   0xb   : > { %p224_p3 = scmp.eq.s32.totalorder %s1186_s11, 1  ;;  %p1187_p5 = scmp.ge.s32.totalorder %s1704_s10, 1 }
   0xc   : > { %p1793_p4 = por %p2176_p1, %p47_p0  ;;  %p231_p7 = scmp.lt.s32.totalorder %s1704_s10, 3 }
   0xd   : > { %p1798_p6 = por %p224_p3, %p47_p0  ;;  %s1706_s15 = smov [#allocation6]  }
   0xe   : > { %s2180_s12 = scalar_select %p1793_p4, 1, 0 }
   0xf   : > { %s2181_s13 = scalar_select %p1798_p6, 1, 0 }
  0x10   : > { %p1803_p8 = pnand %p1187_p5, %p231_p7  ;;  %s243_s16 = sshll.u32 %s1706_s15, 4  ;;  %s1807_s16 = int_to_ptr.vmem [resolvable:$true] %s243_s16 }
  0x11   : > { %2182 = sst [smem:[#allocation16_spill]] %s2181_s13  ;;  %s1707_s18 = smov [#allocation8]  }
  0x12   : > { %s2183_s14 = scalar_select %p1803_p8, 1, 0 }
  0x13   : > { %p1419_p9 = pneg %p1803_p8  ;;  %s259_s19 = sshll.u32 %s1707_s18, 4  ;;  %s1818_s19 = int_to_ptr.vmem [resolvable:$true] %s259_s19 }
  0x14   : > { %s1708_s20 = smov [#allocation9]   ;;  %s1516_s24 = scalar_lea.hbm %s2168_s1, 1024 }
  0x15   : > { %p1814_p11 = pnand %p1419_p9, %p2176_p1  ;;  %s1820_s21 = sshll.u32 %s1708_s20, 4  ;;  %s276_s21 = int_to_ptr.vmem [resolvable:$true] %s1820_s21 }
  0x16   : > { %p1517_p12 = scmp.ne.s32.totalorder %s2168_s1, %s1516_s24  ;;  %p1523_p5 = scmp.lt.u32.totalorder %s1516_s24, %s2168_s1 }
  0x17   : > { %p1830_p13 = pneg %p1814_p11 }
  0x19   : > { %p1519_p0 = pnand %p1830_p13, %p1517_p12 }
  0x1b   : > { %p1520_p3 = pneg %p1519_p0 }
  0x1d   : > { %p1525_p7 = pnand %p1523_p5, %p1520_p3 }
  0x1f   : > { %1528 = shalt.err (!%p1525_p7)
}
  0x20   : > { %s1529_s15 = scalar_lea.vmem %s1807_s16, 1024  ;;  %p1537_p2 = scmp.lt.s32.totalorder %s1807_s16, %s1807_s16 }
  0x21   : > { %p1530_p9 = scmp.ne.s32.totalorder %s1807_s16, %s1529_s15  ;;  %p1538_p6 = scmp.lt.s32.totalorder %s1529_s15, %s1529_s15 }
  0x23   : > { %p1532_p10 = pnand %p1530_p9, %p1830_p13  ;;  %p1539_p12 = por %p1538_p6, %p1537_p2 }
  0x25   : > { %p1533_p1 = pneg %p1532_p10 }
  0x27   : > { %p1540_p0 = pnand %p1539_p12, %p1533_p1 }
  0x29   : > { %1543 = shalt.err (!%p1540_p0)
}
  0x2a   : > { %s1709_s18 = smov 64   ;;  %s1710_s20 = smov 4  }
  0x2b   : > { %1422 = dma.hbm_to_vmem [thread:$0]  (!%p1814_p11), %s2168_s1, 1024, %s1807_s16, [#allocation7], %s1709_s18, %s1709_s18, %s1710_s20  }
  0x2c   : > { %s1544_s26 = scalar_lea.hbm %s2170_s3, 1024 }
  0x2d   : > { %p1545_p1 = scmp.ne.s32.totalorder %s2170_s3, %s1544_s26  ;;  %p1551_p10 = scmp.lt.u32.totalorder %s1544_s26, %s2170_s3 }
  0x2f   : > { %p1547_p2 = pnand %p1545_p1, %p1830_p13 }
  0x31   : > { %p1548_p6 = pneg %p1547_p2 }
  0x33   : > { %p1553_p3 = pnand %p1551_p10, %p1548_p6 }
  0x35   : > { %1556 = shalt.err (!%p1553_p3)
}
  0x36   : > { %s1557_s16 = scalar_lea.vmem %s1818_s19, 1024  ;;  %p1565_p12 = scmp.lt.s32.totalorder %s1818_s19, %s1818_s19 }
  0x37   : > { %p1558_p5 = scmp.ne.s32.totalorder %s1818_s19, %s1557_s16  ;;  %p1566_p0 = scmp.lt.s32.totalorder %s1557_s16, %s1557_s16 }
  0x39   : > { %p1560_p7 = pnand %p1558_p5, %p1830_p13  ;;  %p1567_p1 = por %p1566_p0, %p1565_p12 }
  0x3b   : > { %p1561_p9 = pneg %p1560_p7 }
  0x3d   : > { %p1568_p2 = pnand %p1567_p1, %p1561_p9 }
  0x3f   : > { %1571 = shalt.err (!%p1568_p2)
}
  0x40   : > { %1425 = dma.hbm_to_vmem [thread:$0]  (!%p1814_p11), %s2170_s3, 1024, %s1818_s19, [#allocation7], %s1709_s18, %s1709_s18, %s1710_s20  }
  0x41   : > { %s1572_s25 = scalar_lea.hbm %s2172_s5, 1024 }
  0x42   : > { %p1573_p6 = scmp.ne.s32.totalorder %s2172_s5, %s1572_s25  ;;  %p1579_p5 = scmp.lt.u32.totalorder %s1572_s25, %s2172_s5 }
  0x44   : > { %p1575_p10 = pnand %p1573_p6, %p1830_p13 }
  0x46   : > { %p1576_p3 = pneg %p1575_p10 }
  0x48   : > { %p1581_p7 = pnand %p1579_p5, %p1576_p3 }
  0x4a   : > { %1584 = shalt.err (!%p1581_p7)
}
  0x4b   : > { %s1585_s16 = scalar_lea.vmem %s276_s21, 1024  ;;  %p1593_p1 = scmp.lt.s32.totalorder %s276_s21, %s276_s21 }
  0x4c   : > { %p1586_p9 = scmp.ne.s32.totalorder %s276_s21, %s1585_s16  ;;  %p1594_p2 = scmp.lt.s32.totalorder %s1585_s16, %s1585_s16 }
  0x4e   : > { %p1588_p12 = pnand %p1586_p9, %p1830_p13  ;;  %p1595_p4 = por %p1594_p2, %p1593_p1 }
  0x50   : > { %p1589_p0 = pneg %p1588_p12 }
  0x52   : > { %p1596_p8 = pnand %p1595_p4, %p1589_p0 }
  0x54   : > { %1599 = shalt.err (!%p1596_p8)
}
  0x55   : > { %1428 = dma.hbm_to_vmem [thread:$0]  (!%p1814_p11), %s2172_s5, 1024, %s276_s21, [#allocation10], %s1709_s18, %s1709_s18, %s1710_s20  }
  0x56   : > { %s1903_s27 = sadd.s32 1, %s1704_s10   ;;  %s34_s22 = sadd.s32 1, %s1700_s9 }
  0x57   : > { %s31_s17 = ssub.s32 %s1704_s10, %s1903_s27  ;;  %p41_p8 = scmp.ne.s32.totalorder %s1700_s9, %s1696_s30 }
  0x58   : > { %p32_p4 = scmp.eq.s32.totalorder %s31_s17, 0  ;;  %p42_p13 = scmp.eq.s32.totalorder %s1704_s10, 0 }
  0x59   : > { %p1440_p6 = scmp.lt.s32.totalorder %s1704_s10, 2  ;;  %p2186_p3 = scmp.eq.s32.totalorder %s1784_s7, 1 }
  0x5a   : > { %s1913_s23 = scalar_select %p32_p4, %s1700_s9, %s34_s22  }
  0x5b   : > { %p43_p10 = por %p42_p13, %p41_p8  ;;  %p1917_p5 = por %p2186_p3, %p41_p8 }
  0x5c   : > { %s295_s25 = sand.u32 1, %s1700_s9   ;;  %s1241_s26 = sshll.u32 %s1704_s10, 10 }
  0x5d   : > { %s1192_s21 = sshll.u32 %s295_s25, 6  ;;  %s1926_s15 = scalar_lea.hbm %s2167_s0, %s1241_s26 }
  0x5e   : > { %s299_s16 = scalar_lea.vmem [#allocation3], %s1192_s21  ;;  %p1928_p11 = pnand %p1440_p6, %p43_p10 }
  0x5f   : > { %s306_s19 = sshll.u32 %s299_s16, 4  ;;  %s1934_s17 = scalar_lea.sflag [#allocation4], %s295_s25  ;;  %s1932_s19 = int_to_ptr.vmem [resolvable:$true] %s306_s19 }
  0x60   : > { %s1600_s22 = scalar_lea.hbm %s1926_s15, 1024  ;;  %p1602_p9 = pneg %p1928_p11 }
  0x61   : > { %p1601_p7 = scmp.ne.s32.totalorder %s1926_s15, %s1600_s22  ;;  %s1605_s28 = scalar_lea.hbm %s2167_s0, 2048 }
  0x62   : > { %p1606_p1 = scmp.lt.u32.totalorder %s1926_s15, %s2167_s0  ;;  %p1607_p2 = scmp.lt.u32.totalorder %s1605_s28, %s1600_s22 }
  0x63   : > { %p1603_p12 = pnand %p1602_p9, %p1601_p7  ;;  %p1609_p8 = scmp.lt.u32.totalorder %s1600_s22, %s1926_s15 }
  0x64   : > { %p1608_p4 = por %p1607_p2, %p1606_p1 }
  0x65   : > { %p1604_p0 = pneg %p1603_p12 }
  0x66   : > { %p1610_p13 = por %p1609_p8, %p1608_p4 }
  0x68   : > { %p1611_p6 = pnand %p1610_p13, %p1604_p0 }
  0x6a   : > { %1614 = shalt.err (!%p1611_p6)
}
  0x6b   : > { %s1615_s25 = scalar_lea.vmem %s1932_s19, 1024  ;;  %s1711_s26 = smov [#allocation3]  }
  0x6c   : > { %p1616_p10 = scmp.ne.s32.totalorder %s1932_s19, %s1615_s25  ;;  %s1620_s21 = sshll.u32 %s1711_s26, 4  ;;  %s1621_s21 = int_to_ptr.vmem [resolvable:$false] %s1620_s21 }
  0x6d   : > { %s1622_s11 = scalar_lea.vmem %s1621_s21, 2048  ;;  %p1623_p12 = scmp.lt.s32.totalorder %s1932_s19, %s1621_s21 }
  0x6e   : > { %p1618_p3 = pnand %p1616_p10, %p1602_p9  ;;  %p1624_p1 = scmp.lt.s32.totalorder %s1622_s11, %s1615_s25 }
  0x70   : > { %p1619_p7 = pneg %p1618_p3  ;;  %p1625_p2 = por %p1624_p1, %p1623_p12 }
  0x72   : > { %p1626_p4 = pnand %p1625_p2, %p1619_p7 }
  0x74   : > { %1629 = shalt.err (!%p1626_p4)
}
  0x75   : > { %1432 = dma.hbm_to_vmem [thread:$0]  (!%p1928_p11), %s1926_s15, 1024, %s1932_s19, %s1934_s17, %s1709_s18, %s1709_s18, %s1710_s20  }
  0x76   : > { %p2189_p9 = scmp.ne.s32.totalorder %s2183_s14, 0 }
  0x77   : > { %s1968_s22 = sand.u32 (!%p2189_p9), 1, %s1696_s30   ;;  %p2190_p0 = scmp.ne.s32.totalorder (!%p2189_p9), %s2180_s12, 0 }
  0x78   : > { %318 = sbr.rel (%p2189_p9) target bundleno = 870 (0x366), region = 52  ;;  %s1196_s28 = sshll.u32 (!%p2189_p9), %s1968_s22, 6 }
  0x79   : > { %s321_s16 = scalar_lea.sflag (!%p2189_p9), [#allocation4], %s1968_s22  ;;  %s1972_s25 = scalar_lea.vmem (!%p2189_p9), [#allocation3], %s1196_s28 }
  0x7f   : > { %1675 = dma.done.wait (%p2190_p0), %s321_s16, 1024  }
  0x80   : > { %1677 = vsyncadd (%p2190_p0), %s321_s16, 4294966272  ;;  %p2191_p11 = scmp.eq.s32.totalorder %s1784_s7, 0 }
  0x82   : > { %1679 = dma.done.wait (%p2191_p11), [#allocation7], 2048   ;;  %p2192_p8 = pmov %p2191_p11 }
  0x84   : > { %1681 = vsyncadd (%p2192_p8), [#allocation7], 4294965248  ;;  %p2193_p13 = pmov %p2192_p8 }
  0x85   : > { %p2194_p6 = pmov %p2192_p8 }
  0x86   : > { %1683 = dma.done.wait (%p2193_p13), [#allocation10], 1024  }
  0x87   : > { %1685 = vsyncadd (%p2194_p6), [#allocation10], 4294966272  ;;  %v1484_v0 = vld [vmem:[#allocation6] sm:$0xff]   ;;  %v1485_v1 = vld [vmem:[#allocation6 + $0x8] sm:$0xff]   ;;  %s372_s12 = sld [smem:[#allocation2]]  ;;  %s1200_s19 = sshll.u32 %s1968_s22, 7 }
  0x88   : > { %1291 = vmatprep.subr.bf16.mxu0 %v1484_v0  ;;  %v1486_v2 = vld [vmem:[#allocation6 + $0x10] sm:$0xff]   ;;  %v1487_v3 = vld [vmem:[#allocation6 + $0x18] sm:$0xff]   ;;  %v1492_v4 = vld [vmem:[%s1972_s25] sm:$0xff]   ;;  %s2098_s26 = scalar_lea.vmem [#allocation11], %s1200_s19  ;;  %s1242_s21 = sshll.u32 %s1784_s7, 11 }
  0x89   : > { %1292 = vmatpush3.bf16.msra.mxu0 %v1484_v0  ;;  %1307 = vmatprep.mubr.bf16.mxu0 %v1492_v4  ;;  %v1488_v5 = vld [vmem:[#allocation6 + $0x20] sm:$0xff]   ;;  %v1489_v6 = vld [vmem:[#allocation6 + $0x28] sm:$0xff]   ;;  %v1490_v9 = vld [vmem:[#allocation6 + $0x30] sm:$0xff]   ;;  %s1084_s11 = sshll.u32 %s2098_s26, 4  ;;  %s1071_s7 = scalar_lea.sflag [#allocation5], %s1968_s22  ;;  %s2120_s11 = int_to_ptr.vmem [resolvable:$true] %s1084_s11 }
  0x8a   : > { %1293 = vmatprep.subr.bf16.mxu0 %v1485_v1  ;;  %v1500_v7 = vld [vmem:[#allocation8] sm:$0xff]   ;;  %v1501_v8 = vld [vmem:[#allocation8 + $0x8] sm:$0xff]   ;;  %v1502_v10 = vld [vmem:[#allocation8 + $0x10] sm:$0xff]   ;;  %s1712_s14 = smov [#allocation11]  }
  0x8b   : > { %1323 = vmatprep.subr.bf16.mxu1 %v1500_v7  ;;  %v1491_v11 = vld [vmem:[#allocation6 + $0x38] sm:$0xff]   ;;  %v1504_v13 = vld [vmem:[#allocation8 + $0x20] sm:$0xff]   ;;  %v1493_v14 = vld [vmem:[%s1972_s25 + $0x8] sm:$0xff]   ;;  %s1634_s18 = sshll.u32 %s1712_s14, 4  ;;  %s1635_s18 = int_to_ptr.vmem [resolvable:$false] %s1634_s18 }
  0x8c   : > { %1324 = vmatpush3.bf16.msra.mxu1 %v1500_v7  ;;  %v1503_v12 = vld [vmem:[#allocation8 + $0x18] sm:$0xff]   ;;  %v1494_v15 = vld [vmem:[%s1972_s25 + $0x10] sm:$0xff]   ;;  %v1496_v17 = vld [vmem:[%s1972_s25 + $0x20] sm:$0xff]   ;;  %s1636_s20 = scalar_lea.vmem %s1635_s18, 4096  ;;  %p1637_p12 = scmp.lt.s32.totalorder %s2120_s11, %s1635_s18 }
  0x8d   : > { %1294 = vmatpush3.bf16.msra.mxu0 %v1485_v1  ;;  %1325 = vmatprep.subr.bf16.mxu1 %v1501_v8  ;;  %v1495_v16 = vld [vmem:[%s1972_s25 + $0x18] sm:$0xff]   ;;  %v1497_v18 = vld [vmem:[%s1972_s25 + $0x28] sm:$0xff]   ;;  %v1498_v19 = vld [vmem:[%s1972_s25 + $0x30] sm:$0xff]   ;;  %v2015_v31 = vstv %s372_s12  ;;  %s1630_s12 = scalar_lea.vmem %s2120_s11, 2048 }
  0x8e   : > { %1295 = vmatprep.subr.bf16.mxu0 %v1486_v2  ;;  %v1499_v20 = vld [vmem:[%s1972_s25 + $0x38] sm:$0xff]   ;;  %v1505_v21 = vld [vmem:[#allocation8 + $0x28] sm:$0xff]   ;;  %v1506_v22 = vld [vmem:[#allocation8 + $0x30] sm:$0xff]   ;;  %s2118_s25 = scalar_lea.hbm %s2175_s8, %s1242_s21  ;;  %p1631_p10 = scmp.ne.s32.totalorder %s2120_s11, %s1630_s12 }
  0x8f   : > { %v1507_v23 = vld [vmem:[#allocation8 + $0x38] sm:$0xff]   ;;  %v1508_v24 = vld [vmem:[#allocation9] sm:$0xff]   ;;  %v1994_v25 = vld [vmem:[#allocation9 + $0x8] sm:$0xff]   ;;  %p1638_p1 = scmp.lt.s32.totalorder %s1636_s20, %s1630_s12 }
  0x90   : > { %1326 = vmatpush3.bf16.msra.mxu1 %v1501_v8  ;;  %v1997_v26 = vld [vmem:[#allocation9 + $0x10] sm:$0xff]   ;;  %v2001_v27 = vld [vmem:[#allocation9 + $0x18] sm:$0xff]   ;;  %v2005_v28 = vld [vmem:[#allocation9 + $0x20] sm:$0xff]   ;;  %p1632_p3 = pnand %p1631_p10, %p1917_p5 }
  0x91   : > { %1296 = vmatpush3.bf16.msra.mxu0 %v1486_v2  ;;  %1327 = vmatprep.subr.bf16.mxu1 %v1502_v10  ;;  %v2013_v29 = vld [vmem:[%s2169_s2] ss:$0 sm:$0xff]  ;;  %p1639_p2 = por %p1638_p1, %p1637_p12 }
  0x92   : > { %1297 = vmatprep.subr.bf16.mxu0 %v1487_v3  ;;  %p1633_p7 = pneg %p1632_p3 }
  0x94   : > { %1328 = vmatpush3.bf16.msra.mxu1 %v1502_v10  ;;  %p1640_p4 = pnand %p1639_p2, %p1633_p7 }
  0x95   : > { %1298 = vmatpush3.bf16.msra.mxu0 %v1487_v3  ;;  %1329 = vmatprep.subr.bf16.mxu1 %v1503_v12 }
  0x96   : > { %1299 = vmatprep.subr.bf16.mxu0 %v1488_v5 }
  0x98   : > { %1330 = vmatpush3.bf16.msra.mxu1 %v1503_v12 }
  0x99   : > { %1300 = vmatpush3.bf16.msra.mxu0 %v1488_v5  ;;  %1331 = vmatprep.subr.bf16.mxu1 %v1504_v13 }
  0x9a   : > { %1301 = vmatprep.subr.bf16.mxu0 %v1489_v6 }
  0x9c   : > { %1332 = vmatpush3.bf16.msra.mxu1 %v1504_v13 }
  0x9d   : > { %1302 = vmatpush3.bf16.msra.mxu0 %v1489_v6  ;;  %1333 = vmatprep.subr.bf16.mxu1 %v1505_v21 }
  0x9e   : > { %1303 = vmatprep.subr.bf16.mxu0 %v1490_v9 }
  0xa0   : > { %1334 = vmatpush3.bf16.msra.mxu1 %v1505_v21 }
  0xa1   : > { %1304 = vmatpush3.bf16.msra.mxu0 %v1490_v9  ;;  %1335 = vmatprep.subr.bf16.mxu1 %v1506_v22 }
  0xa2   : > { %1305 = vmatprep.subr.bf16.mxu0 %v1491_v11 }
  0xa4   : > { %1336 = vmatpush3.bf16.msra.mxu1 %v1506_v22 }
  0xa5   : > { %1306 = vmatpush3.bf16.msra.mxu0 %v1491_v11  ;;  %1337 = vmatprep.subr.bf16.mxu1 %v1507_v23 }
  0xa6   : > { %1355 = vmatprep.subr.bf16.mxu0 %v1508_v24 }
  0xa8   : > { %1308 = vmatmul.mubr.bf16.vlgmr.msra.gmra.mrb[0].mxu0 %v1493_v14  ;;  %1338 = vmatpush3.bf16.msra.mxu1 %v1507_v23 }
  0xa9   : > { %1311 = vmatprep.mubr.bf16.mxu0 %v1494_v15  ;;  %1387 = vmatprep.subr.bf16.mxu1 %v1508_v24 }
  0xaa   : > { %1356 = vmatpush3.bf16.msra.mxu0 %v1508_v24 }
  0xab   : > { %1357 = vmatprep.subr.bf16.mxu0 %v1994_v25 }
  0xae   : > { %1358 = vmatpush3.bf16.msra.mxu0 %v1994_v25 }
  0xaf   : > { %1359 = vmatprep.subr.bf16.mxu0 %v1997_v26 }
  0xb0   : > { %1312 = vmatmul.mubr.bf16.gmra.mrb[4].mxu0 %v1495_v16 }
  0xb1   : > { %1315 = vmatprep.mubr.bf16.mxu0 %v1496_v17 }
  0xb2   : > { %1360 = vmatpush3.bf16.msra.mxu0 %v1997_v26 }
  0xb3   : > { %1361 = vmatprep.subr.bf16.mxu0 %v2001_v27 }
  0xb6   : > { %1362 = vmatpush3.bf16.msra.mxu0 %v2001_v27 }
  0xb7   : > { %1363 = vmatprep.subr.bf16.mxu0 %v2005_v28 }
  0xb8   : > { %1316 = vmatmul.mubr.bf16.gmra.mrb[8].mxu0 %v1497_v18 }
  0xb9   : > { %1319 = vmatprep.mubr.bf16.mxu0 %v1498_v19 }
  0xba   : > { %1364 = vmatpush3.bf16.msra.mxu0 %v2005_v28 }
  0xc0   : > { %1320 = vmatmul.mubr.bf16.gmra.mrb[12].mxu0 %v1499_v20 }
 0x17b   : > { %v1309_v30 = vpop.f32.mrb[0].mxu0 }
 0x17c   : > { %v551_v32 = vadd.f32 %v1309_v30, %v2013_v29  ;;  %v542_v33 = vpop.f32.mrb[1].mxu0 }
 0x17d   : > { %v543_v34 = vadd.f32 %v2013_v29, %v542_v33  ;;  %v1310_v35 = vpop.f32.mrb[2].mxu0 }
 0x17e   : > { %v624_v36 = vmul.f32 %v2015_v31, %v551_v32  ;;  %v554_v37 = vadd.f32 %v1310_v35, %v2013_v29  ;;  %v545_v38 = vpop.f32.mrb[3].mxu0  ;;  %vm607_vm0 = vcmp.ge.f32.partialorder %v551_v32, 0.0 }
 0x17f   : > { %v622_v39 = vmul.f32 %v2015_v31, %v543_v34  ;;  %v546_v40 = vadd.f32 %v2013_v29, %v545_v38  ;;  %vm605_vm2 = vcmp.ge.f32.partialorder %v543_v34, 0.0 }
 0x180   : > { %vm608_vm1 = vcmp.ge.f32.partialorder %v554_v37, 0.0  ;;  %v625_v41 = vmul.f32 %v2015_v31, %v554_v37  ;;  %v640_v43 = vsel %vm607_vm0, %v551_v32, %v624_v36 }
 0x181   : > { %v623_v42 = vmul.f32 %v2015_v31, %v546_v40  ;;  %vm606_vm3 = vcmp.ge.f32.partialorder %v546_v40, 0.0  ;;  %v638_v46 = vsel %vm605_vm2, %v543_v34, %v622_v39 }
 0x182   : > { %v641_v44 = vsel %vm608_vm1, %v554_v37, %v625_v41 }
 0x183   : > { %v1313_v45 = vpop.f32.mrb[4].mxu0  ;;  %v639_v47 = vsel %vm606_vm3, %v546_v40, %v623_v42  ;;  %v655_v48 = vpack.c.bf16 %v641_v44, %v640_v43  ;;  %v1513_v42 = vld [vmem:[#allocation9 + $0x28] sm:$0xff]   ;;  %v2060_v43 = vld [vmem:[%s2171_s4] ss:$0 sm:$0xff] }
 0x184   : > { %v567_v49 = vadd.f32 %v1313_v45, %v2013_v29  ;;  %v558_v50 = vpop.f32.mrb[5].mxu0  ;;  %v654_v51 = vpack.c.bf16 %v639_v47, %v638_v46  ;;  %1365 = vmatprep.subr.bf16.mxu0 %v1513_v42 }
 0x185   : > { %v559_v52 = vadd.f32 %v2013_v29, %v558_v50  ;;  %v1314_v53 = vpop.f32.mrb[6].mxu0  ;;  %1366 = vmatpush3.bf16.msra.mxu0 %v1513_v42 }
 0x186   : > { %v628_v54 = vmul.f32 %v2015_v31, %v567_v49  ;;  %v570_v55 = vadd.f32 %v1314_v53, %v2013_v29  ;;  %v561_v56 = vpop.f32.mrb[7].mxu0  ;;  %1339 = vmatprep.mubr.bf16.mxu1 %v654_v51  ;;  %vm611_vm4 = vcmp.ge.f32.partialorder %v567_v49, 0.0 }
 0x187   : > { %v626_v57 = vmul.f32 %v2015_v31, %v559_v52  ;;  %v562_v58 = vadd.f32 %v2013_v29, %v561_v56  ;;  %1340 = vmatmul.mubr.bf16.vlgmr.msra.gmra.mrb[0].mxu1 %v655_v48  ;;  %vm609_vm5 = vcmp.ge.f32.partialorder %v559_v52, 0.0 }
 0x188   : > { %vm612_vm6 = vcmp.ge.f32.partialorder %v570_v55, 0.0  ;;  %v629_v59 = vmul.f32 %v2015_v31, %v570_v55  ;;  %1395 = vmatpush3.bf16.msra.mxu1 %v1508_v24  ;;  %v644_v61 = vsel %vm611_vm4, %v567_v49, %v628_v54 }
 0x189   : > { %vm610_vm7 = vcmp.ge.f32.partialorder %v562_v58, 0.0  ;;  %v627_v60 = vmul.f32 %v2015_v31, %v562_v58  ;;  %1388 = vmatprep.subr.bf16.mxu1 %v1994_v25  ;;  %v642_v0 = vsel %vm609_vm5, %v559_v52, %v626_v57 }
 0x18a   : > { %v645_v62 = vsel %vm612_vm6, %v570_v55, %v629_v59 }
 0x18b   : > { %v1317_v63 = vpop.f32.mrb[8].mxu0  ;;  %v643_v1 = vsel %vm610_vm7, %v562_v58, %v627_v60  ;;  %v657_v2 = vpack.c.bf16 %v645_v62, %v644_v61 }
 0x18c   : > { %v583_v3 = vadd.f32 %v1317_v63, %v2013_v29  ;;  %v574_v4 = vpop.f32.mrb[9].mxu0  ;;  %v656_v5 = vpack.c.bf16 %v643_v1, %v642_v0  ;;  %1396 = vmatpush3.bf16.msra.mxu1 %v1994_v25 }
 0x18d   : > { %v575_v6 = vadd.f32 %v2013_v29, %v574_v4  ;;  %v1318_v7 = vpop.f32.mrb[10].mxu0  ;;  %1389 = vmatprep.subr.bf16.mxu1 %v1997_v26 }
 0x18e   : > { %v632_v8 = vmul.f32 %v2015_v31, %v583_v3  ;;  %v586_v9 = vadd.f32 %v1318_v7, %v2013_v29  ;;  %v577_v10 = vpop.f32.mrb[11].mxu0  ;;  %1343 = vmatprep.mubr.bf16.mxu1 %v656_v5  ;;  %vm615_vm8 = vcmp.ge.f32.partialorder %v583_v3, 0.0 }
 0x18f   : > { %v630_v11 = vmul.f32 %v2015_v31, %v575_v6  ;;  %v578_v12 = vadd.f32 %v2013_v29, %v577_v10  ;;  %1344 = vmatmul.mubr.bf16.gmra.mrb[4].mxu1 %v657_v2  ;;  %vm613_vm9 = vcmp.ge.f32.partialorder %v575_v6, 0.0 }
 0x190   : > { %vm616_vm10 = vcmp.ge.f32.partialorder %v586_v9, 0.0  ;;  %v633_v13 = vmul.f32 %v2015_v31, %v586_v9  ;;  %1397 = vmatpush3.bf16.msra.mxu1 %v1997_v26  ;;  %v648_v15 = vsel %vm615_vm8, %v583_v3, %v632_v8 }
 0x191   : > { %vm614_vm11 = vcmp.ge.f32.partialorder %v578_v12, 0.0  ;;  %v631_v14 = vmul.f32 %v2015_v31, %v578_v12  ;;  %1390 = vmatprep.subr.bf16.mxu1 %v2001_v27  ;;  %v646_v18 = vsel %vm613_vm9, %v575_v6, %v630_v11 }
 0x192   : > { %v649_v16 = vsel %vm616_vm10, %v586_v9, %v633_v13 }
 0x193   : > { %v1321_v17 = vpop.f32.mrb[12].mxu0  ;;  %v647_v19 = vsel %vm614_vm11, %v578_v12, %v631_v14  ;;  %v659_v20 = vpack.c.bf16 %v649_v16, %v648_v15 }
 0x194   : > { %v599_v21 = vadd.f32 %v1321_v17, %v2013_v29  ;;  %v590_v22 = vpop.f32.mrb[13].mxu0  ;;  %v658_v23 = vpack.c.bf16 %v647_v19, %v646_v18  ;;  %1398 = vmatpush3.bf16.msra.mxu1 %v2001_v27 }
 0x195   : > { %v591_v24 = vadd.f32 %v2013_v29, %v590_v22  ;;  %v1322_v25 = vpop.f32.mrb[14].mxu0  ;;  %1391 = vmatprep.subr.bf16.mxu1 %v2005_v28 }
 0x196   : > { %v636_v26 = vmul.f32 %v2015_v31, %v599_v21  ;;  %v602_v30 = vadd.f32 %v1322_v25, %v2013_v29  ;;  %v593_v32 = vpop.f32.mrb[15].mxu0  ;;  %1347 = vmatprep.mubr.bf16.mxu1 %v658_v23  ;;  %vm619_vm12 = vcmp.ge.f32.partialorder %v599_v21, 0.0 }
 0x197   : > { %v634_v33 = vmul.f32 %v2015_v31, %v591_v24  ;;  %v594_v34 = vadd.f32 %v2013_v29, %v593_v32  ;;  %1348 = vmatmul.mubr.bf16.gmra.mrb[8].mxu1 %v659_v20  ;;  %vm617_vm13 = vcmp.ge.f32.partialorder %v591_v24, 0.0  ;;  %v1514_v29 = vld [vmem:[#allocation9 + $0x30] sm:$0xff]  }
 0x198   : > { %vm620_vm14 = vcmp.ge.f32.partialorder %v602_v30, 0.0  ;;  %v637_v27 = vmul.f32 %v2015_v31, %v602_v30  ;;  %1399 = vmatpush3.bf16.msra.mxu1 %v2005_v28  ;;  %v652_v36 = vsel %vm619_vm12, %v599_v21, %v636_v26  ;;  %1367 = vmatprep.subr.bf16.mxu0 %v1514_v29  ;;  %v1515_v28 = vld [vmem:[#allocation9 + $0x38] sm:$0xff]  }
 0x199   : > { %vm618_vm15 = vcmp.ge.f32.partialorder %v594_v34, 0.0  ;;  %v635_v35 = vmul.f32 %v2015_v31, %v594_v34  ;;  %v650_v38 = vsel %vm617_vm13, %v591_v24, %v634_v33  ;;  %1392 = vmatprep.subr.bf16.mxu1 %v1513_v42  ;;  %1368 = vmatpush3.bf16.msra.mxu0 %v1514_v29 }
 0x19a   : > { %v653_v37 = vsel %vm620_vm14, %v602_v30, %v637_v27  ;;  %1369 = vmatprep.subr.bf16.mxu0 %v1515_v28 }
 0x19b   : > { %v651_v39 = vsel %vm618_vm15, %v594_v34, %v635_v35  ;;  %v661_v40 = vpack.c.bf16 %v653_v37, %v652_v36 }
 0x19c   : > { %v660_v41 = vpack.c.bf16 %v651_v39, %v650_v38  ;;  %1400 = vmatpush3.bf16.msra.mxu1 %v1513_v42 }
 0x19d   : > { %1393 = vmatprep.subr.bf16.mxu1 %v1514_v29  ;;  %1370 = vmatpush3.bf16.msra.mxu0 %v1515_v28 }
 0x19e   : > { %1351 = vmatprep.mubr.bf16.mxu1 %v660_v41 }
 0x19f   : > { %1352 = vmatmul.mubr.bf16.gmra.mrb[12].mxu1 %v661_v40 }
 0x1a0   : > { %1401 = vmatpush3.bf16.msra.mxu1 %v1514_v29 }
 0x1a1   : > { %1394 = vmatprep.subr.bf16.mxu1 %v1515_v28 }
 0x1a4   : > { %1402 = vmatpush3.bf16.msra.mxu1 %v1515_v28 }
 0x25a   : > { %v1341_v44 = vpop.f32.mrb[0].mxu1 }
 0x25b   : > { %v776_v45 = vadd.f32 %v1341_v44, %v2060_v43  ;;  %v767_v46 = vpop.f32.mrb[1].mxu1 }
 0x25c   : > { %v768_v47 = vadd.f32 %v2060_v43, %v767_v46  ;;  %v1342_v48 = vpop.f32.mrb[2].mxu1 }
 0x25d   : > { %v848_v49 = vmul.f32 %v776_v45, %v2015_v31  ;;  %v779_v50 = vadd.f32 %v1342_v48, %v2060_v43  ;;  %v770_v51 = vpop.f32.mrb[3].mxu1  ;;  %vm832_vm0 = vcmp.ge.f32.partialorder %v776_v45, 0.0 }
 0x25e   : > { %v846_v52 = vmul.f32 %v768_v47, %v2015_v31  ;;  %v771_v53 = vadd.f32 %v2060_v43, %v770_v51  ;;  %vm830_vm1 = vcmp.ge.f32.partialorder %v768_v47, 0.0 }
 0x25f   : > { %vm833_vm2 = vcmp.ge.f32.partialorder %v779_v50, 0.0  ;;  %v849_v54 = vmul.f32 %v779_v50, %v2015_v31  ;;  %v864_v56 = vsel %vm832_vm0, %v776_v45, %v848_v49 }
 0x260   : > { %vm831_vm3 = vcmp.ge.f32.partialorder %v771_v53, 0.0  ;;  %v847_v55 = vmul.f32 %v771_v53, %v2015_v31  ;;  %v862_v60 = vsel %vm830_vm1, %v768_v47, %v846_v52 }
 0x261   : > { %v865_v57 = vsel %vm833_vm2, %v779_v50, %v849_v54 }
 0x262   : > { %v879_v58 = vpack.c.bf16 %v865_v57, %v864_v56  ;;  %v1345_v59 = vpop.f32.mrb[4].mxu1  ;;  %v863_v61 = vsel %vm831_vm3, %v771_v53, %v847_v55 }
 0x263   : > { %v792_v62 = vadd.f32 %v1345_v59, %v2060_v43  ;;  %v783_v63 = vpop.f32.mrb[5].mxu1  ;;  %v878_v0 = vpack.c.bf16 %v863_v61, %v862_v60 }
 0x264   : > { %v784_v1 = vadd.f32 %v2060_v43, %v783_v63  ;;  %v1346_v2 = vpop.f32.mrb[6].mxu1 }
 0x265   : > { %v852_v3 = vmul.f32 %v792_v62, %v2015_v31  ;;  %v795_v4 = vadd.f32 %v1346_v2, %v2060_v43  ;;  %v786_v5 = vpop.f32.mrb[7].mxu1  ;;  %1371 = vmatprep.mubr.bf16.mxu0 %v878_v0  ;;  %vm836_vm4 = vcmp.ge.f32.partialorder %v792_v62, 0.0 }
 0x266   : > { %v850_v6 = vmul.f32 %v784_v1, %v2015_v31  ;;  %v787_v7 = vadd.f32 %v2060_v43, %v786_v5  ;;  %1372 = vmatmul.mubr.bf16.vlgmr.msra.gmra.mrb[16].mxu0 %v879_v58  ;;  %vm834_vm5 = vcmp.ge.f32.partialorder %v784_v1, 0.0 }
 0x267   : > { %vm837_vm6 = vcmp.ge.f32.partialorder %v795_v4, 0.0  ;;  %v853_v8 = vmul.f32 %v795_v4, %v2015_v31  ;;  %v868_v10 = vsel %vm836_vm4, %v792_v62, %v852_v3 }
 0x268   : > { %vm835_vm7 = vcmp.ge.f32.partialorder %v787_v7, 0.0  ;;  %v851_v9 = vmul.f32 %v787_v7, %v2015_v31  ;;  %v866_v13 = vsel %vm834_vm5, %v784_v1, %v850_v6 }
 0x269   : > { %v869_v11 = vsel %vm837_vm6, %v795_v4, %v853_v8 }
 0x26a   : > { %v1349_v12 = vpop.f32.mrb[8].mxu1  ;;  %v867_v14 = vsel %vm835_vm7, %v787_v7, %v851_v9  ;;  %v881_v15 = vpack.c.bf16 %v869_v11, %v868_v10 }
 0x26b   : > { %v808_v16 = vadd.f32 %v1349_v12, %v2060_v43  ;;  %v799_v17 = vpop.f32.mrb[9].mxu1  ;;  %v880_v18 = vpack.c.bf16 %v867_v14, %v866_v13 }
 0x26c   : > { %v800_v19 = vadd.f32 %v2060_v43, %v799_v17  ;;  %v1350_v20 = vpop.f32.mrb[10].mxu1 }
 0x26d   : > { %v856_v21 = vmul.f32 %v808_v16, %v2015_v31  ;;  %v811_v22 = vadd.f32 %v1350_v20, %v2060_v43  ;;  %v802_v23 = vpop.f32.mrb[11].mxu1  ;;  %1375 = vmatprep.mubr.bf16.mxu0 %v880_v18  ;;  %vm840_vm8 = vcmp.ge.f32.partialorder %v808_v16, 0.0 }
 0x26e   : > { %v854_v24 = vmul.f32 %v800_v19, %v2015_v31  ;;  %v803_v25 = vadd.f32 %v2060_v43, %v802_v23  ;;  %1376 = vmatmul.mubr.bf16.gmra.mrb[20].mxu0 %v881_v15  ;;  %vm838_vm9 = vcmp.ge.f32.partialorder %v800_v19, 0.0 }
 0x26f   : > { %vm841_vm10 = vcmp.ge.f32.partialorder %v811_v22, 0.0  ;;  %v857_v26 = vmul.f32 %v811_v22, %v2015_v31  ;;  %v872_v32 = vsel %vm840_vm8, %v808_v16, %v856_v21 }
 0x270   : > { %vm839_vm11 = vcmp.ge.f32.partialorder %v803_v25, 0.0  ;;  %v855_v30 = vmul.f32 %v803_v25, %v2015_v31  ;;  %v870_v35 = vsel %vm838_vm9, %v800_v19, %v854_v24 }
 0x271   : > { %v873_v33 = vsel %vm841_vm10, %v811_v22, %v857_v26 }
 0x272   : > { %v883_v34 = vpack.c.bf16 %v873_v33, %v872_v32  ;;  %v1353_v27 = vpop.f32.mrb[12].mxu1  ;;  %v871_v36 = vsel %vm839_vm11, %v803_v25, %v855_v30 }
 0x273   : > { %v824_v37 = vadd.f32 %v1353_v27, %v2060_v43  ;;  %v815_v38 = vpop.f32.mrb[13].mxu1  ;;  %v882_v39 = vpack.c.bf16 %v871_v36, %v870_v35 }
 0x274   : > { %v816_v40 = vadd.f32 %v2060_v43, %v815_v38  ;;  %v1354_v41 = vpop.f32.mrb[14].mxu1 }
 0x275   : > { %v860_v42 = vmul.f32 %v824_v37, %v2015_v31  ;;  %v827_v29 = vadd.f32 %v1354_v41, %v2060_v43  ;;  %v818_v28 = vpop.f32.mrb[15].mxu1  ;;  %1379 = vmatprep.mubr.bf16.mxu1 %v882_v39  ;;  %vm844_vm12 = vcmp.ge.f32.partialorder %v824_v37, 0.0 }
 0x276   : > { %v858_v44 = vmul.f32 %v816_v40, %v2015_v31  ;;  %v819_v45 = vadd.f32 %v2060_v43, %v818_v28  ;;  %1380 = vmatmul.mubr.bf16.vlgmr.msra.gmra.mrb[16].mxu1 %v883_v34  ;;  %vm842_vm13 = vcmp.ge.f32.partialorder %v816_v40, 0.0  ;;  %v1227_v43 = vld [vmem:[%s2173_s6] ss:$0 sm:$0xff] }
 0x277   : > { %vm845_vm14 = vcmp.ge.f32.partialorder %v827_v29, 0.0  ;;  %v861_v46 = vmul.f32 %v827_v29, %v2015_v31  ;;  %v876_v48 = vsel %vm844_vm12, %v824_v37, %v860_v42 }
 0x278   : > { %vm843_vm15 = vcmp.ge.f32.partialorder %v819_v45, 0.0  ;;  %v859_v47 = vmul.f32 %v819_v45, %v2015_v31  ;;  %v874_v50 = vsel %vm842_vm13, %v816_v40, %v858_v44 }
 0x279   : > { %v877_v49 = vsel %vm845_vm14, %v827_v29, %v861_v46 }
 0x27a   : > { %v875_v51 = vsel %vm843_vm15, %v819_v45, %v859_v47  ;;  %v885_v52 = vpack.c.bf16 %v877_v49, %v876_v48 }
 0x27b   : > { %v884_v53 = vpack.c.bf16 %v875_v51, %v874_v50 }
 0x27d   : > { %1383 = vmatprep.mubr.bf16.mxu1 %v884_v53 }
 0x27e   : > { %1384 = vmatmul.mubr.bf16.gmra.mrb[20].mxu1 %v885_v52 }
 0x339   : > { %v1373_v54 = vpop.f32.mrb[16].mxu0 }
 0x33a   : > { %v1000_v55 = vadd.f32 %v1373_v54, %v1227_v43  ;;  %v991_v56 = vpop.f32.mrb[17].mxu0 }
 0x33b   : > { %v992_v57 = vadd.f32 %v1227_v43, %v991_v56  ;;  %v1374_v58 = vpop.f32.mrb[18].mxu0 }
 0x33c   : > { %1056 = vst [vmem:[%s2098_s26 + $0x10] sm:$0xff] %v1000_v55  ;;  %v1003_v31 = vadd.f32 %v1374_v58, %v1227_v43  ;;  %v994_v59 = vpop.f32.mrb[19].mxu0 }
 0x33d   : > { %1054 = vst [vmem:[%s2098_s26] sm:$0xff] %v992_v57  ;;  %v995_v60 = vadd.f32 %v1227_v43, %v994_v59 }
 0x33e   : > { %1057 = vst [vmem:[%s2098_s26 + $0x18] sm:$0xff] %v1003_v31 }
 0x33f   : > { %1055 = vst [vmem:[%s2098_s26 + $0x8] sm:$0xff] %v995_v60 }
 0x341   : > { %v1377_v61 = vpop.f32.mrb[20].mxu0 }
 0x342   : > { %v1016_v62 = vadd.f32 %v1377_v61, %v1227_v43  ;;  %v1007_v63 = vpop.f32.mrb[21].mxu0 }
 0x343   : > { %v1008_v0 = vadd.f32 %v1227_v43, %v1007_v63  ;;  %v1378_v1 = vpop.f32.mrb[22].mxu0 }
 0x344   : > { %1060 = vst [vmem:[%s2098_s26 + $0x30] sm:$0xff] %v1016_v62  ;;  %v1019_v2 = vadd.f32 %v1378_v1, %v1227_v43  ;;  %v1010_v3 = vpop.f32.mrb[23].mxu0 }
 0x345   : > { %1058 = vst [vmem:[%s2098_s26 + $0x20] sm:$0xff] %v1008_v0  ;;  %v1011_v4 = vadd.f32 %v1227_v43, %v1010_v3 }
 0x346   : > { %1061 = vst [vmem:[%s2098_s26 + $0x38] sm:$0xff] %v1019_v2 }
 0x347   : > { %1059 = vst [vmem:[%s2098_s26 + $0x28] sm:$0xff] %v1011_v4 }
 0x349   : > { %v1381_v5 = vpop.f32.mrb[16].mxu1 }
 0x34a   : > { %v1032_v6 = vadd.f32 %v1381_v5, %v1227_v43  ;;  %v1023_v7 = vpop.f32.mrb[17].mxu1 }
 0x34b   : > { %v1024_v8 = vadd.f32 %v1227_v43, %v1023_v7  ;;  %v1382_v9 = vpop.f32.mrb[18].mxu1 }
 0x34c   : > { %1064 = vst [vmem:[%s2098_s26 + $0x50] sm:$0xff] %v1032_v6  ;;  %v1035_v10 = vadd.f32 %v1382_v9, %v1227_v43  ;;  %v1026_v11 = vpop.f32.mrb[19].mxu1 }
 0x34d   : > { %1062 = vst [vmem:[%s2098_s26 + $0x40] sm:$0xff] %v1024_v8  ;;  %v1027_v12 = vadd.f32 %v1227_v43, %v1026_v11 }
 0x34e   : > { %1065 = vst [vmem:[%s2098_s26 + $0x58] sm:$0xff] %v1035_v10 }
 0x34f   : > { %1063 = vst [vmem:[%s2098_s26 + $0x48] sm:$0xff] %v1027_v12 }
 0x351   : > { %v1385_v13 = vpop.f32.mrb[20].mxu1 }
 0x352   : > { %v1048_v14 = vadd.f32 %v1385_v13, %v1227_v43  ;;  %v1039_v15 = vpop.f32.mrb[21].mxu1 }
 0x353   : > { %v1040_v16 = vadd.f32 %v1227_v43, %v1039_v15  ;;  %v1386_v17 = vpop.f32.mrb[22].mxu1 }
 0x354   : > { %1068 = vst [vmem:[%s2098_s26 + $0x70] sm:$0xff] %v1048_v14  ;;  %v1051_v18 = vadd.f32 %v1386_v17, %v1227_v43  ;;  %v1042_v19 = vpop.f32.mrb[23].mxu1 }
 0x355   : > { %1066 = vst [vmem:[%s2098_s26 + $0x60] sm:$0xff] %v1040_v16  ;;  %v1043_v20 = vadd.f32 %v1227_v43, %v1042_v19 }
 0x356   : > { %1069 = vst [vmem:[%s2098_s26 + $0x78] sm:$0xff] %v1051_v18 }
 0x357   : > { %1067 = vst [vmem:[%s2098_s26 + $0x68] sm:$0xff] %v1043_v20 }
 0x358   : > { %1643 = shalt.err (!%p1640_p4)
}
 0x359   : > { %s1644_s15 = scalar_lea.hbm %s2118_s25, 2048  ;;  %s1648_s17 = scalar_lea.hbm %s2175_s8, 4096 }
 0x35a   : > { %p1645_p9 = scmp.ne.s32.totalorder %s2118_s25, %s1644_s15  ;;  %p1649_p8 = scmp.lt.u32.totalorder %s2118_s25, %s2175_s8 }
 0x35b   : > { %p1650_p13 = scmp.lt.u32.totalorder %s1648_s17, %s1644_s15  ;;  %p1652_p10 = scmp.lt.u32.totalorder %s1644_s15, %s2118_s25 }
 0x35c   : > { %p1646_p0 = pnand %p1645_p9, %p1917_p5 }
 0x35d   : > { %p1651_p6 = por %p1650_p13, %p1649_p8 }
 0x35e   : > { %p1647_p11 = pneg %p1646_p0 }
 0x35f   : > { %p1653_p3 = por %p1652_p10, %p1651_p6 }
 0x361   : > { %p1654_p7 = pnand %p1653_p3, %p1647_p11 }
 0x363   : > { %1657 = shalt.err (!%p1654_p7)
}
 0x364   : > { %s1713_s28 = smov 128   ;;  %s1714_s16 = smov 8  }
 0x365   : > { %1417 = dma.vmem_to_hbm [thread:$0]  (%p1917_p5), %s2120_s11, 2048, %s2118_s25, %s1071_s7, %s1713_s28, %s1713_s28, %s1714_s16  }
 0x366 PF: > { %s2195_s12 = sld [smem:[#allocation16_spill]]  ;;  %s1099_s14 = sand.u32 1, %s1692_s29  }
 0x367   : > { %p2197_p1 = scmp.ge.s32.totalorder %s1704_s10, 2  ;;  %s1100_s18 = scalar_lea.sflag [#allocation5], %s1099_s14 }
 0x36c   : > { %p2196_p12 = scmp.ne.s32.totalorder %s2195_s12, 0 }
 0x36e   : > { %p1434_p2 = pnand %p2197_p1, %p2196_p12 }
 0x370   : > { %1687 = dma.done.wait (!%p1434_p2), %s1100_s18, 2048  }
 0x371   : > { %1689 = vsyncadd (!%p1434_p2), %s1100_s18, 4294965248  ;;  %p24_p4 = scmp.ge.s32.totalorder %s1903_s27, 4   ;;  %s2198_s29 = smov %s1696_s30 }
 0x372   : > { %s2199_s30 = smov %s1700_s9  ;;  %s2200_s9 = smov %s1913_s23 }
 0x373   : > { %s2201_s10 = smov %s1903_s27  ;;  %26 = sbr.rel (!%p24_p4) target bundleno = 9 (0x9), region = 109 }
 0x37a   :  { %1105 = vsyncpa [#allocation4], 1 }
 0x37b   :  { %1107 = vsyncpa [#allocation4 + $0x1], 1 }
 0x37c   :  { %1108 = vsyncpa [#allocation7], 1 }
 0x37d   :  { %1109 = vsyncpa [#allocation10], 1 }
 0x37e   :  { %1110 = vsyncpa [#allocation5], 1 }
 0x37f   :  { %1112 = vsyncpa [#allocation5 + $0x1], 1 }

// kernel: tpu_custom_call.1
= control target key start
LH: loop header
LB: loop body
LE: loop exit
PB: predicated region body
PF: predicated region fallthrough
CT: control target
= control target key end

     0   :  { %s2167_s0 = inlined_call_operand.hbm [shape: bf16[250,128], index: 0, kind: input, shape index: {}]   ;;  %s2168_s1 = inlined_call_operand.hbm [shape: bf16[128,128], index: 1, kind: input, shape index: {}]   ;;  %s2169_s2 = inlined_call_operand.vmem [shape: f32[1,128], index: 2, kind: input, shape index: {}]   ;;  %s2170_s3 = inlined_call_operand.hbm [shape: bf16[128,128], index: 3, kind: input, shape index: {}]   ;;  %s2171_s4 = inlined_call_operand.vmem [shape: f32[1,128], index: 4, kind: input, shape index: {}]   ;;  %s2172_s5 = inlined_call_operand.hbm [shape: bf16[128,128], index: 5, kind: input, shape index: {}]   ;;  %s2173_s6 = inlined_call_operand.vmem [shape: f32[1,128], index: 6, kind: input, shape index: {}]   ;;  %s2174_s7 = inlined_call_operand.<no memory space> [shape: f32[1,1], index: 7, kind: input, shape index: {}]   ;;  %s2175_s8 = inlined_call_operand.hbm [shape: f32[250,128], index: 8, kind: output, shape index: {}]  }
   0x1   :  { %13 = sst [smem:[#allocation2]] %s2174_s7 }
   0x2   :  { %14 = vsyncpa [#allocation4], 0 }
   0x3   :  { %16 = vsyncpa [#allocation4 + $0x1], 0 }
   0x4   :  { %17 = vsyncpa [#allocation7], 0 }
   0x5   :  { %18 = vsyncpa [#allocation10], 0 }
   0x6   :  { %19 = vsyncpa [#allocation5], 0 }
   0x7   :  { %21 = vsyncpa [#allocation5 + $0x1], 0  ;;  %s1763_s29 = smov 0   ;;  %s1765_s30 = smov 0  }
   0x8   :  { %s1767_s9 = smov 0   ;;  %s1769_s10 = smov 0  }
   0x9 LB: > { %s1784_s7 = sadd.s32 4294967295, %s1704_s10   ;;  %s1186_s11 = sadd.s32 4294967294, %s1704_s10   ;;  %s1704_s10 = sphi %s1769_s10, %s2201_s10   ;;  %s1700_s9 = sphi %s1767_s9, %s2200_s9   ;;  %s1696_s30 = sphi %s1765_s30, %s2199_s30   ;;  %s1692_s29 = sphi %s1763_s29, %s2198_s29  }
   0xa   : > { %p47_p0 = scmp.ne.s32.totalorder %s1696_s30, %s1692_s29  ;;  %p2176_p1 = scmp.eq.s32.totalorder %s1784_s7, 0 }
   0xb   : > { %p224_p3 = scmp.eq.s32.totalorder %s1186_s11, 1  ;;  %p1187_p5 = scmp.ge.s32.totalorder %s1704_s10, 1 }
   0xc   : > { %p1793_p4 = por %p2176_p1, %p47_p0  ;;  %p231_p7 = scmp.lt.s32.totalorder %s1704_s10, 3 }
   0xd   : > { %p1798_p6 = por %p224_p3, %p47_p0  ;;  %s1706_s15 = smov [#allocation6]  }
   0xe   : > { %s2180_s12 = scalar_select %p1793_p4, 1, 0 }
   0xf   : > { %s2181_s13 = scalar_select %p1798_p6, 1, 0 }
  0x10   : > { %p1803_p8 = pnand %p1187_p5, %p231_p7  ;;  %s243_s16 = sshll.u32 %s1706_s15, 4  ;;  %s1807_s16 = int_to_ptr.vmem [resolvable:$true] %s243_s16 }
  0x11   : > { %2182 = sst [smem:[#allocation16_spill]] %s2181_s13  ;;  %s1707_s18 = smov [#allocation8]  }
  0x12   : > { %s2183_s14 = scalar_select %p1803_p8, 1, 0 }
  0x13   : > { %p1419_p9 = pneg %p1803_p8  ;;  %s259_s19 = sshll.u32 %s1707_s18, 4  ;;  %s1818_s19 = int_to_ptr.vmem [resolvable:$true] %s259_s19 }
  0x14   : > { %s1708_s20 = smov [#allocation9]   ;;  %s1516_s24 = scalar_lea.hbm %s2168_s1, 1024 }
  0x15   : > { %p1814_p11 = pnand %p1419_p9, %p2176_p1  ;;  %s1820_s21 = sshll.u32 %s1708_s20, 4  ;;  %s276_s21 = int_to_ptr.vmem [resolvable:$true] %s1820_s21 }
  0x16   : > { %p1517_p12 = scmp.ne.s32.totalorder %s2168_s1, %s1516_s24  ;;  %p1523_p5 = scmp.lt.u32.totalorder %s1516_s24, %s2168_s1 }
  0x17   : > { %p1830_p13 = pneg %p1814_p11 }
  0x19   : > { %p1519_p0 = pnand %p1830_p13, %p1517_p12 }
  0x1b   : > { %p1520_p3 = pneg %p1519_p0 }
  0x1d   : > { %p1525_p7 = pnand %p1523_p5, %p1520_p3 }
  0x1f   : > { %1528 = shalt.err (!%p1525_p7)
}
  0x20   : > { %s1529_s15 = scalar_lea.vmem %s1807_s16, 1024  ;;  %p1537_p2 = scmp.lt.s32.totalorder %s1807_s16, %s1807_s16 }
  0x21   : > { %p1530_p9 = scmp.ne.s32.totalorder %s1807_s16, %s1529_s15  ;;  %p1538_p6 = scmp.lt.s32.totalorder %s1529_s15, %s1529_s15 }
  0x23   : > { %p1532_p10 = pnand %p1530_p9, %p1830_p13  ;;  %p1539_p12 = por %p1538_p6, %p1537_p2 }
  0x25   : > { %p1533_p1 = pneg %p1532_p10 }
  0x27   : > { %p1540_p0 = pnand %p1539_p12, %p1533_p1 }
  0x29   : > { %1543 = shalt.err (!%p1540_p0)
}
  0x2a   : > { %s1709_s18 = smov 64   ;;  %s1710_s20 = smov 4  }
  0x2b   : > { %1422 = dma.hbm_to_vmem [thread:$0]  (!%p1814_p11), %s2168_s1, 1024, %s1807_s16, [#allocation7], %s1709_s18, %s1709_s18, %s1710_s20  }
  0x2c   : > { %s1544_s26 = scalar_lea.hbm %s2170_s3, 1024 }
  0x2d   : > { %p1545_p1 = scmp.ne.s32.totalorder %s2170_s3, %s1544_s26  ;;  %p1551_p10 = scmp.lt.u32.totalorder %s1544_s26, %s2170_s3 }
  0x2f   : > { %p1547_p2 = pnand %p1545_p1, %p1830_p13 }
  0x31   : > { %p1548_p6 = pneg %p1547_p2 }
  0x33   : > { %p1553_p3 = pnand %p1551_p10, %p1548_p6 }
  0x35   : > { %1556 = shalt.err (!%p1553_p3)
}
  0x36   : > { %s1557_s16 = scalar_lea.vmem %s1818_s19, 1024  ;;  %p1565_p12 = scmp.lt.s32.totalorder %s1818_s19, %s1818_s19 }
  0x37   : > { %p1558_p5 = scmp.ne.s32.totalorder %s1818_s19, %s1557_s16  ;;  %p1566_p0 = scmp.lt.s32.totalorder %s1557_s16, %s1557_s16 }
  0x39   : > { %p1560_p7 = pnand %p1558_p5, %p1830_p13  ;;  %p1567_p1 = por %p1566_p0, %p1565_p12 }
  0x3b   : > { %p1561_p9 = pneg %p1560_p7 }
  0x3d   : > { %p1568_p2 = pnand %p1567_p1, %p1561_p9 }
  0x3f   : > { %1571 = shalt.err (!%p1568_p2)
}
  0x40   : > { %1425 = dma.hbm_to_vmem [thread:$0]  (!%p1814_p11), %s2170_s3, 1024, %s1818_s19, [#allocation7], %s1709_s18, %s1709_s18, %s1710_s20  }
  0x41   : > { %s1572_s25 = scalar_lea.hbm %s2172_s5, 1024 }
  0x42   : > { %p1573_p6 = scmp.ne.s32.totalorder %s2172_s5, %s1572_s25  ;;  %p1579_p5 = scmp.lt.u32.totalorder %s1572_s25, %s2172_s5 }
  0x44   : > { %p1575_p10 = pnand %p1573_p6, %p1830_p13 }
  0x46   : > { %p1576_p3 = pneg %p1575_p10 }
  0x48   : > { %p1581_p7 = pnand %p1579_p5, %p1576_p3 }
  0x4a   : > { %1584 = shalt.err (!%p1581_p7)
}
  0x4b   : > { %s1585_s16 = scalar_lea.vmem %s276_s21, 1024  ;;  %p1593_p1 = scmp.lt.s32.totalorder %s276_s21, %s276_s21 }
  0x4c   : > { %p1586_p9 = scmp.ne.s32.totalorder %s276_s21, %s1585_s16  ;;  %p1594_p2 = scmp.lt.s32.totalorder %s1585_s16, %s1585_s16 }
  0x4e   : > { %p1588_p12 = pnand %p1586_p9, %p1830_p13  ;;  %p1595_p4 = por %p1594_p2, %p1593_p1 }
  0x50   : > { %p1589_p0 = pneg %p1588_p12 }
  0x52   : > { %p1596_p8 = pnand %p1595_p4, %p1589_p0 }
  0x54   : > { %1599 = shalt.err (!%p1596_p8)
}
  0x55   : > { %1428 = dma.hbm_to_vmem [thread:$0]  (!%p1814_p11), %s2172_s5, 1024, %s276_s21, [#allocation10], %s1709_s18, %s1709_s18, %s1710_s20  }
  0x56   : > { %s1903_s27 = sadd.s32 1, %s1704_s10   ;;  %s34_s22 = sadd.s32 1, %s1700_s9 }
  0x57   : > { %s31_s17 = ssub.s32 %s1704_s10, %s1903_s27  ;;  %p41_p8 = scmp.ne.s32.totalorder %s1700_s9, %s1696_s30 }
  0x58   : > { %p32_p4 = scmp.eq.s32.totalorder %s31_s17, 0  ;;  %p42_p13 = scmp.eq.s32.totalorder %s1704_s10, 0 }
  0x59   : > { %p1440_p6 = scmp.lt.s32.totalorder %s1704_s10, 2  ;;  %p2186_p3 = scmp.eq.s32.totalorder %s1784_s7, 1 }
  0x5a   : > { %s1913_s23 = scalar_select %p32_p4, %s1700_s9, %s34_s22  }
  0x5b   : > { %p43_p10 = por %p42_p13, %p41_p8  ;;  %p1917_p5 = por %p2186_p3, %p41_p8 }
  0x5c   : > { %s295_s25 = sand.u32 1, %s1700_s9   ;;  %s1241_s26 = sshll.u32 %s1704_s10, 10 }
  0x5d   : > { %s1192_s21 = sshll.u32 %s295_s25, 6  ;;  %s1926_s15 = scalar_lea.hbm %s2167_s0, %s1241_s26 }
  0x5e   : > { %s299_s16 = scalar_lea.vmem [#allocation3], %s1192_s21  ;;  %p1928_p11 = pnand %p1440_p6, %p43_p10 }
  0x5f   : > { %s306_s19 = sshll.u32 %s299_s16, 4  ;;  %s1934_s17 = scalar_lea.sflag [#allocation4], %s295_s25  ;;  %s1932_s19 = int_to_ptr.vmem [resolvable:$true] %s306_s19 }
  0x60   : > { %s1600_s22 = scalar_lea.hbm %s1926_s15, 1024  ;;  %p1602_p9 = pneg %p1928_p11 }
  0x61   : > { %p1601_p7 = scmp.ne.s32.totalorder %s1926_s15, %s1600_s22  ;;  %s1605_s28 = scalar_lea.hbm %s2167_s0, 2048 }
  0x62   : > { %p1606_p1 = scmp.lt.u32.totalorder %s1926_s15, %s2167_s0  ;;  %p1607_p2 = scmp.lt.u32.totalorder %s1605_s28, %s1600_s22 }
  0x63   : > { %p1603_p12 = pnand %p1602_p9, %p1601_p7  ;;  %p1609_p8 = scmp.lt.u32.totalorder %s1600_s22, %s1926_s15 }
  0x64   : > { %p1608_p4 = por %p1607_p2, %p1606_p1 }
  0x65   : > { %p1604_p0 = pneg %p1603_p12 }
  0x66   : > { %p1610_p13 = por %p1609_p8, %p1608_p4 }
  0x68   : > { %p1611_p6 = pnand %p1610_p13, %p1604_p0 }
  0x6a   : > { %1614 = shalt.err (!%p1611_p6)
}
  0x6b   : > { %s1615_s25 = scalar_lea.vmem %s1932_s19, 1024  ;;  %s1711_s26 = smov [#allocation3]  }
  0x6c   : > { %p1616_p10 = scmp.ne.s32.totalorder %s1932_s19, %s1615_s25  ;;  %s1620_s21 = sshll.u32 %s1711_s26, 4  ;;  %s1621_s21 = int_to_ptr.vmem [resolvable:$false] %s1620_s21 }
  0x6d   : > { %s1622_s11 = scalar_lea.vmem %s1621_s21, 2048  ;;  %p1623_p12 = scmp.lt.s32.totalorder %s1932_s19, %s1621_s21 }
  0x6e   : > { %p1618_p3 = pnand %p1616_p10, %p1602_p9  ;;  %p1624_p1 = scmp.lt.s32.totalorder %s1622_s11, %s1615_s25 }
  0x70   : > { %p1619_p7 = pneg %p1618_p3  ;;  %p1625_p2 = por %p1624_p1, %p1623_p12 }
  0x72   : > { %p1626_p4 = pnand %p1625_p2, %p1619_p7 }
  0x74   : > { %1629 = shalt.err (!%p1626_p4)
}
  0x75   : > { %1432 = dma.hbm_to_vmem [thread:$0]  (!%p1928_p11), %s1926_s15, 1024, %s1932_s19, %s1934_s17, %s1709_s18, %s1709_s18, %s1710_s20  }
  0x76   : > { %p2189_p9 = scmp.ne.s32.totalorder %s2183_s14, 0 }
  0x77   : > { %s1968_s22 = sand.u32 (!%p2189_p9), 1, %s1696_s30   ;;  %p2190_p0 = scmp.ne.s32.totalorder (!%p2189_p9), %s2180_s12, 0 }
  0x78   : > { %318 = sbr.rel (%p2189_p9) target bundleno = 870 (0x366), region = 52  ;;  %s1196_s28 = sshll.u32 (!%p2189_p9), %s1968_s22, 6 }
  0x79   : > { %s321_s16 = scalar_lea.sflag (!%p2189_p9), [#allocation4], %s1968_s22  ;;  %s1972_s25 = scalar_lea.vmem (!%p2189_p9), [#allocation3], %s1196_s28 }
  0x7f   : > { %1675 = dma.done.wait (%p2190_p0), %s321_s16, 1024  }
  0x80   : > { %1677 = vsyncadd (%p2190_p0), %s321_s16, 4294966272  ;;  %p2191_p11 = scmp.eq.s32.totalorder %s1784_s7, 0 }
  0x82   : > { %1679 = dma.done.wait (%p2191_p11), [#allocation7], 2048   ;;  %p2192_p8 = pmov %p2191_p11 }
  0x84   : > { %1681 = vsyncadd (%p2192_p8), [#allocation7], 4294965248  ;;  %p2193_p13 = pmov %p2192_p8 }
  0x85   : > { %p2194_p6 = pmov %p2192_p8 }
  0x86   : > { %1683 = dma.done.wait (%p2193_p13), [#allocation10], 1024  }
  0x87   : > { %1685 = vsyncadd (%p2194_p6), [#allocation10], 4294966272  ;;  %v1484_v0 = vld [vmem:[#allocation6] sm:$0xff]   ;;  %v1485_v1 = vld [vmem:[#allocation6 + $0x8] sm:$0xff]   ;;  %s372_s12 = sld [smem:[#allocation2]]  ;;  %s1200_s19 = sshll.u32 %s1968_s22, 7 }
  0x88   : > { %1291 = vmatprep.subr.bf16.mxu0 %v1484_v0  ;;  %v1486_v2 = vld [vmem:[#allocation6 + $0x10] sm:$0xff]   ;;  %v1487_v3 = vld [vmem:[#allocation6 + $0x18] sm:$0xff]   ;;  %v1492_v4 = vld [vmem:[%s1972_s25] sm:$0xff]   ;;  %s2098_s26 = scalar_lea.vmem [#allocation11], %s1200_s19  ;;  %s1242_s21 = sshll.u32 %s1784_s7, 11 }
  0x89   : > { %1292 = vmatpush3.bf16.msra.mxu0 %v1484_v0  ;;  %1307 = vmatprep.mubr.bf16.mxu0 %v1492_v4  ;;  %v1488_v5 = vld [vmem:[#allocation6 + $0x20] sm:$0xff]   ;;  %v1489_v6 = vld [vmem:[#allocation6 + $0x28] sm:$0xff]   ;;  %v1490_v9 = vld [vmem:[#allocation6 + $0x30] sm:$0xff]   ;;  %s1084_s11 = sshll.u32 %s2098_s26, 4  ;;  %s1071_s7 = scalar_lea.sflag [#allocation5], %s1968_s22  ;;  %s2120_s11 = int_to_ptr.vmem [resolvable:$true] %s1084_s11 }
  0x8a   : > { %1293 = vmatprep.subr.bf16.mxu0 %v1485_v1  ;;  %v1500_v7 = vld [vmem:[#allocation8] sm:$0xff]   ;;  %v1501_v8 = vld [vmem:[#allocation8 + $0x8] sm:$0xff]   ;;  %v1502_v10 = vld [vmem:[#allocation8 + $0x10] sm:$0xff]   ;;  %s1712_s14 = smov [#allocation11]  }
  0x8b   : > { %1323 = vmatprep.subr.bf16.mxu1 %v1500_v7  ;;  %v1491_v11 = vld [vmem:[#allocation6 + $0x38] sm:$0xff]   ;;  %v1504_v13 = vld [vmem:[#allocation8 + $0x20] sm:$0xff]   ;;  %v1493_v14 = vld [vmem:[%s1972_s25 + $0x8] sm:$0xff]   ;;  %s1634_s18 = sshll.u32 %s1712_s14, 4  ;;  %s1635_s18 = int_to_ptr.vmem [resolvable:$false] %s1634_s18 }
  0x8c   : > { %1324 = vmatpush3.bf16.msra.mxu1 %v1500_v7  ;;  %v1503_v12 = vld [vmem:[#allocation8 + $0x18] sm:$0xff]   ;;  %v1494_v15 = vld [vmem:[%s1972_s25 + $0x10] sm:$0xff]   ;;  %v1496_v17 = vld [vmem:[%s1972_s25 + $0x20] sm:$0xff]   ;;  %s1636_s20 = scalar_lea.vmem %s1635_s18, 4096  ;;  %p1637_p12 = scmp.lt.s32.totalorder %s2120_s11, %s1635_s18 }
  0x8d   : > { %1294 = vmatpush3.bf16.msra.mxu0 %v1485_v1  ;;  %1325 = vmatprep.subr.bf16.mxu1 %v1501_v8  ;;  %v1495_v16 = vld [vmem:[%s1972_s25 + $0x18] sm:$0xff]   ;;  %v1497_v18 = vld [vmem:[%s1972_s25 + $0x28] sm:$0xff]   ;;  %v1498_v19 = vld [vmem:[%s1972_s25 + $0x30] sm:$0xff]   ;;  %v2015_v31 = vstv %s372_s12  ;;  %s1630_s12 = scalar_lea.vmem %s2120_s11, 2048 }
  0x8e   : > { %1295 = vmatprep.subr.bf16.mxu0 %v1486_v2  ;;  %v1499_v20 = vld [vmem:[%s1972_s25 + $0x38] sm:$0xff]   ;;  %v1505_v21 = vld [vmem:[#allocation8 + $0x28] sm:$0xff]   ;;  %v1506_v22 = vld [vmem:[#allocation8 + $0x30] sm:$0xff]   ;;  %s2118_s25 = scalar_lea.hbm %s2175_s8, %s1242_s21  ;;  %p1631_p10 = scmp.ne.s32.totalorder %s2120_s11, %s1630_s12 }
  0x8f   : > { %v1507_v23 = vld [vmem:[#allocation8 + $0x38] sm:$0xff]   ;;  %v1508_v24 = vld [vmem:[#allocation9] sm:$0xff]   ;;  %v1994_v25 = vld [vmem:[#allocation9 + $0x8] sm:$0xff]   ;;  %p1638_p1 = scmp.lt.s32.totalorder %s1636_s20, %s1630_s12 }
  0x90   : > { %1326 = vmatpush3.bf16.msra.mxu1 %v1501_v8  ;;  %v1997_v26 = vld [vmem:[#allocation9 + $0x10] sm:$0xff]   ;;  %v2001_v27 = vld [vmem:[#allocation9 + $0x18] sm:$0xff]   ;;  %v2005_v28 = vld [vmem:[#allocation9 + $0x20] sm:$0xff]   ;;  %p1632_p3 = pnand %p1631_p10, %p1917_p5 }
  0x91   : > { %1296 = vmatpush3.bf16.msra.mxu0 %v1486_v2  ;;  %1327 = vmatprep.subr.bf16.mxu1 %v1502_v10  ;;  %v2013_v29 = vld [vmem:[%s2169_s2] ss:$0 sm:$0xff]  ;;  %p1639_p2 = por %p1638_p1, %p1637_p12 }
  0x92   : > { %1297 = vmatprep.subr.bf16.mxu0 %v1487_v3  ;;  %p1633_p7 = pneg %p1632_p3 }
  0x94   : > { %1328 = vmatpush3.bf16.msra.mxu1 %v1502_v10  ;;  %p1640_p4 = pnand %p1639_p2, %p1633_p7 }
  0x95   : > { %1298 = vmatpush3.bf16.msra.mxu0 %v1487_v3  ;;  %1329 = vmatprep.subr.bf16.mxu1 %v1503_v12 }
  0x96   : > { %1299 = vmatprep.subr.bf16.mxu0 %v1488_v5 }
  0x98   : > { %1330 = vmatpush3.bf16.msra.mxu1 %v1503_v12 }
  0x99   : > { %1300 = vmatpush3.bf16.msra.mxu0 %v1488_v5  ;;  %1331 = vmatprep.subr.bf16.mxu1 %v1504_v13 }
  0x9a   : > { %1301 = vmatprep.subr.bf16.mxu0 %v1489_v6 }
  0x9c   : > { %1332 = vmatpush3.bf16.msra.mxu1 %v1504_v13 }
  0x9d   : > { %1302 = vmatpush3.bf16.msra.mxu0 %v1489_v6  ;;  %1333 = vmatprep.subr.bf16.mxu1 %v1505_v21 }
  0x9e   : > { %1303 = vmatprep.subr.bf16.mxu0 %v1490_v9 }
  0xa0   : > { %1334 = vmatpush3.bf16.msra.mxu1 %v1505_v21 }
  0xa1   : > { %1304 = vmatpush3.bf16.msra.mxu0 %v1490_v9  ;;  %1335 = vmatprep.subr.bf16.mxu1 %v1506_v22 }
  0xa2   : > { %1305 = vmatprep.subr.bf16.mxu0 %v1491_v11 }
  0xa4   : > { %1336 = vmatpush3.bf16.msra.mxu1 %v1506_v22 }
  0xa5   : > { %1306 = vmatpush3.bf16.msra.mxu0 %v1491_v11  ;;  %1337 = vmatprep.subr.bf16.mxu1 %v1507_v23 }
  0xa6   : > { %1355 = vmatprep.subr.bf16.mxu0 %v1508_v24 }
  0xa8   : > { %1308 = vmatmul.mubr.bf16.vlgmr.msra.gmra.mrb[0].mxu0 %v1493_v14  ;;  %1338 = vmatpush3.bf16.msra.mxu1 %v1507_v23 }
  0xa9   : > { %1311 = vmatprep.mubr.bf16.mxu0 %v1494_v15  ;;  %1387 = vmatprep.subr.bf16.mxu1 %v1508_v24 }
  0xaa   : > { %1356 = vmatpush3.bf16.msra.mxu0 %v1508_v24 }
  0xab   : > { %1357 = vmatprep.subr.bf16.mxu0 %v1994_v25 }
  0xae   : > { %1358 = vmatpush3.bf16.msra.mxu0 %v1994_v25 }
  0xaf   : > { %1359 = vmatprep.subr.bf16.mxu0 %v1997_v26 }
  0xb0   : > { %1312 = vmatmul.mubr.bf16.gmra.mrb[4].mxu0 %v1495_v16 }
  0xb1   : > { %1315 = vmatprep.mubr.bf16.mxu0 %v1496_v17 }
  0xb2   : > { %1360 = vmatpush3.bf16.msra.mxu0 %v1997_v26 }
  0xb3   : > { %1361 = vmatprep.subr.bf16.mxu0 %v2001_v27 }
  0xb6   : > { %1362 = vmatpush3.bf16.msra.mxu0 %v2001_v27 }
  0xb7   : > { %1363 = vmatprep.subr.bf16.mxu0 %v2005_v28 }
  0xb8   : > { %1316 = vmatmul.mubr.bf16.gmra.mrb[8].mxu0 %v1497_v18 }
  0xb9   : > { %1319 = vmatprep.mubr.bf16.mxu0 %v1498_v19 }
  0xba   : > { %1364 = vmatpush3.bf16.msra.mxu0 %v2005_v28 }
  0xc0   : > { %1320 = vmatmul.mubr.bf16.gmra.mrb[12].mxu0 %v1499_v20 }
 0x17b   : > { %v1309_v30 = vpop.f32.mrb[0].mxu0 }
 0x17c   : > { %v551_v32 = vadd.f32 %v1309_v30, %v2013_v29  ;;  %v542_v33 = vpop.f32.mrb[1].mxu0 }
 0x17d   : > { %v543_v34 = vadd.f32 %v2013_v29, %v542_v33  ;;  %v1310_v35 = vpop.f32.mrb[2].mxu0 }
 0x17e   : > { %v624_v36 = vmul.f32 %v2015_v31, %v551_v32  ;;  %v554_v37 = vadd.f32 %v1310_v35, %v2013_v29  ;;  %v545_v38 = vpop.f32.mrb[3].mxu0  ;;  %vm607_vm0 = vcmp.ge.f32.partialorder %v551_v32, 0.0 }
 0x17f   : > { %v622_v39 = vmul.f32 %v2015_v31, %v543_v34  ;;  %v546_v40 = vadd.f32 %v2013_v29, %v545_v38  ;;  %vm605_vm2 = vcmp.ge.f32.partialorder %v543_v34, 0.0 }
 0x180   : > { %vm608_vm1 = vcmp.ge.f32.partialorder %v554_v37, 0.0  ;;  %v625_v41 = vmul.f32 %v2015_v31, %v554_v37  ;;  %v640_v43 = vsel %vm607_vm0, %v551_v32, %v624_v36 }
 0x181   : > { %v623_v42 = vmul.f32 %v2015_v31, %v546_v40  ;;  %vm606_vm3 = vcmp.ge.f32.partialorder %v546_v40, 0.0  ;;  %v638_v46 = vsel %vm605_vm2, %v543_v34, %v622_v39 }
 0x182   : > { %v641_v44 = vsel %vm608_vm1, %v554_v37, %v625_v41 }
 0x183   : > { %v1313_v45 = vpop.f32.mrb[4].mxu0  ;;  %v639_v47 = vsel %vm606_vm3, %v546_v40, %v623_v42  ;;  %v655_v48 = vpack.c.bf16 %v641_v44, %v640_v43  ;;  %v1513_v42 = vld [vmem:[#allocation9 + $0x28] sm:$0xff]   ;;  %v2060_v43 = vld [vmem:[%s2171_s4] ss:$0 sm:$0xff] }
 0x184   : > { %v567_v49 = vadd.f32 %v1313_v45, %v2013_v29  ;;  %v558_v50 = vpop.f32.mrb[5].mxu0  ;;  %v654_v51 = vpack.c.bf16 %v639_v47, %v638_v46  ;;  %1365 = vmatprep.subr.bf16.mxu0 %v1513_v42 }
 0x185   : > { %v559_v52 = vadd.f32 %v2013_v29, %v558_v50  ;;  %v1314_v53 = vpop.f32.mrb[6].mxu0  ;;  %1366 = vmatpush3.bf16.msra.mxu0 %v1513_v42 }
 0x186   : > { %v628_v54 = vmul.f32 %v2015_v31, %v567_v49  ;;  %v570_v55 = vadd.f32 %v1314_v53, %v2013_v29  ;;  %v561_v56 = vpop.f32.mrb[7].mxu0  ;;  %1339 = vmatprep.mubr.bf16.mxu1 %v654_v51  ;;  %vm611_vm4 = vcmp.ge.f32.partialorder %v567_v49, 0.0 }
 0x187   : > { %v626_v57 = vmul.f32 %v2015_v31, %v559_v52  ;;  %v562_v58 = vadd.f32 %v2013_v29, %v561_v56  ;;  %1340 = vmatmul.mubr.bf16.vlgmr.msra.gmra.mrb[0].mxu1 %v655_v48  ;;  %vm609_vm5 = vcmp.ge.f32.partialorder %v559_v52, 0.0 }
 0x188   : > { %vm612_vm6 = vcmp.ge.f32.partialorder %v570_v55, 0.0  ;;  %v629_v59 = vmul.f32 %v2015_v31, %v570_v55  ;;  %1395 = vmatpush3.bf16.msra.mxu1 %v1508_v24  ;;  %v644_v61 = vsel %vm611_vm4, %v567_v49, %v628_v54 }
 0x189   : > { %vm610_vm7 = vcmp.ge.f32.partialorder %v562_v58, 0.0  ;;  %v627_v60 = vmul.f32 %v2015_v31, %v562_v58  ;;  %1388 = vmatprep.subr.bf16.mxu1 %v1994_v25  ;;  %v642_v0 = vsel %vm609_vm5, %v559_v52, %v626_v57 }
 0x18a   : > { %v645_v62 = vsel %vm612_vm6, %v570_v55, %v629_v59 }
 0x18b   : > { %v1317_v63 = vpop.f32.mrb[8].mxu0  ;;  %v643_v1 = vsel %vm610_vm7, %v562_v58, %v627_v60  ;;  %v657_v2 = vpack.c.bf16 %v645_v62, %v644_v61 }
 0x18c   : > { %v583_v3 = vadd.f32 %v1317_v63, %v2013_v29  ;;  %v574_v4 = vpop.f32.mrb[9].mxu0  ;;  %v656_v5 = vpack.c.bf16 %v643_v1, %v642_v0  ;;  %1396 = vmatpush3.bf16.msra.mxu1 %v1994_v25 }
 0x18d   : > { %v575_v6 = vadd.f32 %v2013_v29, %v574_v4  ;;  %v1318_v7 = vpop.f32.mrb[10].mxu0  ;;  %1389 = vmatprep.subr.bf16.mxu1 %v1997_v26 }
 0x18e   : > { %v632_v8 = vmul.f32 %v2015_v31, %v583_v3  ;;  %v586_v9 = vadd.f32 %v1318_v7, %v2013_v29  ;;  %v577_v10 = vpop.f32.mrb[11].mxu0  ;;  %1343 = vmatprep.mubr.bf16.mxu1 %v656_v5  ;;  %vm615_vm8 = vcmp.ge.f32.partialorder %v583_v3, 0.0 }
 0x18f   : > { %v630_v11 = vmul.f32 %v2015_v31, %v575_v6  ;;  %v578_v12 = vadd.f32 %v2013_v29, %v577_v10  ;;  %1344 = vmatmul.mubr.bf16.gmra.mrb[4].mxu1 %v657_v2  ;;  %vm613_vm9 = vcmp.ge.f32.partialorder %v575_v6, 0.0 }
 0x190   : > { %vm616_vm10 = vcmp.ge.f32.partialorder %v586_v9, 0.0  ;;  %v633_v13 = vmul.f32 %v2015_v31, %v586_v9  ;;  %1397 = vmatpush3.bf16.msra.mxu1 %v1997_v26  ;;  %v648_v15 = vsel %vm615_vm8, %v583_v3, %v632_v8 }
 0x191   : > { %vm614_vm11 = vcmp.ge.f32.partialorder %v578_v12, 0.0  ;;  %v631_v14 = vmul.f32 %v2015_v31, %v578_v12  ;;  %1390 = vmatprep.subr.bf16.mxu1 %v2001_v27  ;;  %v646_v18 = vsel %vm613_vm9, %v575_v6, %v630_v11 }
 0x192   : > { %v649_v16 = vsel %vm616_vm10, %v586_v9, %v633_v13 }
 0x193   : > { %v1321_v17 = vpop.f32.mrb[12].mxu0  ;;  %v647_v19 = vsel %vm614_vm11, %v578_v12, %v631_v14  ;;  %v659_v20 = vpack.c.bf16 %v649_v16, %v648_v15 }
 0x194   : > { %v599_v21 = vadd.f32 %v1321_v17, %v2013_v29  ;;  %v590_v22 = vpop.f32.mrb[13].mxu0  ;;  %v658_v23 = vpack.c.bf16 %v647_v19, %v646_v18  ;;  %1398 = vmatpush3.bf16.msra.mxu1 %v2001_v27 }
 0x195   : > { %v591_v24 = vadd.f32 %v2013_v29, %v590_v22  ;;  %v1322_v25 = vpop.f32.mrb[14].mxu0  ;;  %1391 = vmatprep.subr.bf16.mxu1 %v2005_v28 }
 0x196   : > { %v636_v26 = vmul.f32 %v2015_v31, %v599_v21  ;;  %v602_v30 = vadd.f32 %v1322_v25, %v2013_v29  ;;  %v593_v32 = vpop.f32.mrb[15].mxu0  ;;  %1347 = vmatprep.mubr.bf16.mxu1 %v658_v23  ;;  %vm619_vm12 = vcmp.ge.f32.partialorder %v599_v21, 0.0 }
 0x197   : > { %v634_v33 = vmul.f32 %v2015_v31, %v591_v24  ;;  %v594_v34 = vadd.f32 %v2013_v29, %v593_v32  ;;  %1348 = vmatmul.mubr.bf16.gmra.mrb[8].mxu1 %v659_v20  ;;  %vm617_vm13 = vcmp.ge.f32.partialorder %v591_v24, 0.0  ;;  %v1514_v29 = vld [vmem:[#allocation9 + $0x30] sm:$0xff]  }
 0x198   : > { %vm620_vm14 = vcmp.ge.f32.partialorder %v602_v30, 0.0  ;;  %v637_v27 = vmul.f32 %v2015_v31, %v602_v30  ;;  %1399 = vmatpush3.bf16.msra.mxu1 %v2005_v28  ;;  %v652_v36 = vsel %vm619_vm12, %v599_v21, %v636_v26  ;;  %1367 = vmatprep.subr.bf16.mxu0 %v1514_v29  ;;  %v1515_v28 = vld [vmem:[#allocation9 + $0x38] sm:$0xff]  }
 0x199   : > { %vm618_vm15 = vcmp.ge.f32.partialorder %v594_v34, 0.0  ;;  %v635_v35 = vmul.f32 %v2015_v31, %v594_v34  ;;  %v650_v38 = vsel %vm617_vm13, %v591_v24, %v634_v33  ;;  %1392 = vmatprep.subr.bf16.mxu1 %v1513_v42  ;;  %1368 = vmatpush3.bf16.msra.mxu0 %v1514_v29 }
 0x19a   : > { %v653_v37 = vsel %vm620_vm14, %v602_v30, %v637_v27  ;;  %1369 = vmatprep.subr.bf16.mxu0 %v1515_v28 }
 0x19b   : > { %v651_v39 = vsel %vm618_vm15, %v594_v34, %v635_v35  ;;  %v661_v40 = vpack.c.bf16 %v653_v37, %v652_v36 }
 0x19c   : > { %v660_v41 = vpack.c.bf16 %v651_v39, %v650_v38  ;;  %1400 = vmatpush3.bf16.msra.mxu1 %v1513_v42 }
 0x19d   : > { %1393 = vmatprep.subr.bf16.mxu1 %v1514_v29  ;;  %1370 = vmatpush3.bf16.msra.mxu0 %v1515_v28 }
 0x19e   : > { %1351 = vmatprep.mubr.bf16.mxu1 %v660_v41 }
 0x19f   : > { %1352 = vmatmul.mubr.bf16.gmra.mrb[12].mxu1 %v661_v40 }
 0x1a0   : > { %1401 = vmatpush3.bf16.msra.mxu1 %v1514_v29 }
 0x1a1   : > { %1394 = vmatprep.subr.bf16.mxu1 %v1515_v28 }
 0x1a4   : > { %1402 = vmatpush3.bf16.msra.mxu1 %v1515_v28 }
 0x25a   : > { %v1341_v44 = vpop.f32.mrb[0].mxu1 }
 0x25b   : > { %v776_v45 = vadd.f32 %v1341_v44, %v2060_v43  ;;  %v767_v46 = vpop.f32.mrb[1].mxu1 }
 0x25c   : > { %v768_v47 = vadd.f32 %v2060_v43, %v767_v46  ;;  %v1342_v48 = vpop.f32.mrb[2].mxu1 }
 0x25d   : > { %v848_v49 = vmul.f32 %v776_v45, %v2015_v31  ;;  %v779_v50 = vadd.f32 %v1342_v48, %v2060_v43  ;;  %v770_v51 = vpop.f32.mrb[3].mxu1  ;;  %vm832_vm0 = vcmp.ge.f32.partialorder %v776_v45, 0.0 }
 0x25e   : > { %v846_v52 = vmul.f32 %v768_v47, %v2015_v31  ;;  %v771_v53 = vadd.f32 %v2060_v43, %v770_v51  ;;  %vm830_vm1 = vcmp.ge.f32.partialorder %v768_v47, 0.0 }
 0x25f   : > { %vm833_vm2 = vcmp.ge.f32.partialorder %v779_v50, 0.0  ;;  %v849_v54 = vmul.f32 %v779_v50, %v2015_v31  ;;  %v864_v56 = vsel %vm832_vm0, %v776_v45, %v848_v49 }
 0x260   : > { %vm831_vm3 = vcmp.ge.f32.partialorder %v771_v53, 0.0  ;;  %v847_v55 = vmul.f32 %v771_v53, %v2015_v31  ;;  %v862_v60 = vsel %vm830_vm1, %v768_v47, %v846_v52 }
 0x261   : > { %v865_v57 = vsel %vm833_vm2, %v779_v50, %v849_v54 }
 0x262   : > { %v879_v58 = vpack.c.bf16 %v865_v57, %v864_v56  ;;  %v1345_v59 = vpop.f32.mrb[4].mxu1  ;;  %v863_v61 = vsel %vm831_vm3, %v771_v53, %v847_v55 }
 0x263   : > { %v792_v62 = vadd.f32 %v1345_v59, %v2060_v43  ;;  %v783_v63 = vpop.f32.mrb[5].mxu1  ;;  %v878_v0 = vpack.c.bf16 %v863_v61, %v862_v60 }
 0x264   : > { %v784_v1 = vadd.f32 %v2060_v43, %v783_v63  ;;  %v1346_v2 = vpop.f32.mrb[6].mxu1 }
 0x265   : > { %v852_v3 = vmul.f32 %v792_v62, %v2015_v31  ;;  %v795_v4 = vadd.f32 %v1346_v2, %v2060_v43  ;;  %v786_v5 = vpop.f32.mrb[7].mxu1  ;;  %1371 = vmatprep.mubr.bf16.mxu0 %v878_v0  ;;  %vm836_vm4 = vcmp.ge.f32.partialorder %v792_v62, 0.0 }
 0x266   : > { %v850_v6 = vmul.f32 %v784_v1, %v2015_v31  ;;  %v787_v7 = vadd.f32 %v2060_v43, %v786_v5  ;;  %1372 = vmatmul.mubr.bf16.vlgmr.msra.gmra.mrb[16].mxu0 %v879_v58  ;;  %vm834_vm5 = vcmp.ge.f32.partialorder %v784_v1, 0.0 }
 0x267   : > { %vm837_vm6 = vcmp.ge.f32.partialorder %v795_v4, 0.0  ;;  %v853_v8 = vmul.f32 %v795_v4, %v2015_v31  ;;  %v868_v10 = vsel %vm836_vm4, %v792_v62, %v852_v3 }
 0x268   : > { %vm835_vm7 = vcmp.ge.f32.partialorder %v787_v7, 0.0  ;;  %v851_v9 = vmul.f32 %v787_v7, %v2015_v31  ;;  %v866_v13 = vsel %vm834_vm5, %v784_v1, %v850_v6 }
 0x269   : > { %v869_v11 = vsel %vm837_vm6, %v795_v4, %v853_v8 }
 0x26a   : > { %v1349_v12 = vpop.f32.mrb[8].mxu1  ;;  %v867_v14 = vsel %vm835_vm7, %v787_v7, %v851_v9  ;;  %v881_v15 = vpack.c.bf16 %v869_v11, %v868_v10 }
 0x26b   : > { %v808_v16 = vadd.f32 %v1349_v12, %v2060_v43  ;;  %v799_v17 = vpop.f32.mrb[9].mxu1  ;;  %v880_v18 = vpack.c.bf16 %v867_v14, %v866_v13 }
 0x26c   : > { %v800_v19 = vadd.f32 %v2060_v43, %v799_v17  ;;  %v1350_v20 = vpop.f32.mrb[10].mxu1 }
 0x26d   : > { %v856_v21 = vmul.f32 %v808_v16, %v2015_v31  ;;  %v811_v22 = vadd.f32 %v1350_v20, %v2060_v43  ;;  %v802_v23 = vpop.f32.mrb[11].mxu1  ;;  %1375 = vmatprep.mubr.bf16.mxu0 %v880_v18  ;;  %vm840_vm8 = vcmp.ge.f32.partialorder %v808_v16, 0.0 }
 0x26e   : > { %v854_v24 = vmul.f32 %v800_v19, %v2015_v31  ;;  %v803_v25 = vadd.f32 %v2060_v43, %v802_v23  ;;  %1376 = vmatmul.mubr.bf16.gmra.mrb[20].mxu0 %v881_v15  ;;  %vm838_vm9 = vcmp.ge.f32.partialorder %v800_v19, 0.0 }
 0x26f   : > { %vm841_vm10 = vcmp.ge.f32.partialorder %v811_v22, 0.0  ;;  %v857_v26 = vmul.f32 %v811_v22, %v2015_v31  ;;  %v872_v32 = vsel %vm840_vm8, %v808_v16, %v856_v21 }
 0x270   : > { %vm839_vm11 = vcmp.ge.f32.partialorder %v803_v25, 0.0  ;;  %v855_v30 = vmul.f32 %v803_v25, %v2015_v31  ;;  %v870_v35 = vsel %vm838_vm9, %v800_v19, %v854_v24 }
 0x271   : > { %v873_v33 = vsel %vm841_vm10, %v811_v22, %v857_v26 }
 0x272   : > { %v883_v34 = vpack.c.bf16 %v873_v33, %v872_v32  ;;  %v1353_v27 = vpop.f32.mrb[12].mxu1  ;;  %v871_v36 = vsel %vm839_vm11, %v803_v25, %v855_v30 }
 0x273   : > { %v824_v37 = vadd.f32 %v1353_v27, %v2060_v43  ;;  %v815_v38 = vpop.f32.mrb[13].mxu1  ;;  %v882_v39 = vpack.c.bf16 %v871_v36, %v870_v35 }
 0x274   : > { %v816_v40 = vadd.f32 %v2060_v43, %v815_v38  ;;  %v1354_v41 = vpop.f32.mrb[14].mxu1 }
 0x275   : > { %v860_v42 = vmul.f32 %v824_v37, %v2015_v31  ;;  %v827_v29 = vadd.f32 %v1354_v41, %v2060_v43  ;;  %v818_v28 = vpop.f32.mrb[15].mxu1  ;;  %1379 = vmatprep.mubr.bf16.mxu1 %v882_v39  ;;  %vm844_vm12 = vcmp.ge.f32.partialorder %v824_v37, 0.0 }
 0x276   : > { %v858_v44 = vmul.f32 %v816_v40, %v2015_v31  ;;  %v819_v45 = vadd.f32 %v2060_v43, %v818_v28  ;;  %1380 = vmatmul.mubr.bf16.vlgmr.msra.gmra.mrb[16].mxu1 %v883_v34  ;;  %vm842_vm13 = vcmp.ge.f32.partialorder %v816_v40, 0.0  ;;  %v1227_v43 = vld [vmem:[%s2173_s6] ss:$0 sm:$0xff] }
 0x277   : > { %vm845_vm14 = vcmp.ge.f32.partialorder %v827_v29, 0.0  ;;  %v861_v46 = vmul.f32 %v827_v29, %v2015_v31  ;;  %v876_v48 = vsel %vm844_vm12, %v824_v37, %v860_v42 }
 0x278   : > { %vm843_vm15 = vcmp.ge.f32.partialorder %v819_v45, 0.0  ;;  %v859_v47 = vmul.f32 %v819_v45, %v2015_v31  ;;  %v874_v50 = vsel %vm842_vm13, %v816_v40, %v858_v44 }
 0x279   : > { %v877_v49 = vsel %vm845_vm14, %v827_v29, %v861_v46 }
 0x27a   : > { %v875_v51 = vsel %vm843_vm15, %v819_v45, %v859_v47  ;;  %v885_v52 = vpack.c.bf16 %v877_v49, %v876_v48 }
 0x27b   : > { %v884_v53 = vpack.c.bf16 %v875_v51, %v874_v50 }
 0x27d   : > { %1383 = vmatprep.mubr.bf16.mxu1 %v884_v53 }
 0x27e   : > { %1384 = vmatmul.mubr.bf16.gmra.mrb[20].mxu1 %v885_v52 }
 0x339   : > { %v1373_v54 = vpop.f32.mrb[16].mxu0 }
 0x33a   : > { %v1000_v55 = vadd.f32 %v1373_v54, %v1227_v43  ;;  %v991_v56 = vpop.f32.mrb[17].mxu0 }
 0x33b   : > { %v992_v57 = vadd.f32 %v1227_v43, %v991_v56  ;;  %v1374_v58 = vpop.f32.mrb[18].mxu0 }
 0x33c   : > { %1056 = vst [vmem:[%s2098_s26 + $0x10] sm:$0xff] %v1000_v55  ;;  %v1003_v31 = vadd.f32 %v1374_v58, %v1227_v43  ;;  %v994_v59 = vpop.f32.mrb[19].mxu0 }
 0x33d   : > { %1054 = vst [vmem:[%s2098_s26] sm:$0xff] %v992_v57  ;;  %v995_v60 = vadd.f32 %v1227_v43, %v994_v59 }
 0x33e   : > { %1057 = vst [vmem:[%s2098_s26 + $0x18] sm:$0xff] %v1003_v31 }
 0x33f   : > { %1055 = vst [vmem:[%s2098_s26 + $0x8] sm:$0xff] %v995_v60 }
 0x341   : > { %v1377_v61 = vpop.f32.mrb[20].mxu0 }
 0x342   : > { %v1016_v62 = vadd.f32 %v1377_v61, %v1227_v43  ;;  %v1007_v63 = vpop.f32.mrb[21].mxu0 }
 0x343   : > { %v1008_v0 = vadd.f32 %v1227_v43, %v1007_v63  ;;  %v1378_v1 = vpop.f32.mrb[22].mxu0 }
 0x344   : > { %1060 = vst [vmem:[%s2098_s26 + $0x30] sm:$0xff] %v1016_v62  ;;  %v1019_v2 = vadd.f32 %v1378_v1, %v1227_v43  ;;  %v1010_v3 = vpop.f32.mrb[23].mxu0 }
 0x345   : > { %1058 = vst [vmem:[%s2098_s26 + $0x20] sm:$0xff] %v1008_v0  ;;  %v1011_v4 = vadd.f32 %v1227_v43, %v1010_v3 }
 0x346   : > { %1061 = vst [vmem:[%s2098_s26 + $0x38] sm:$0xff] %v1019_v2 }
 0x347   : > { %1059 = vst [vmem:[%s2098_s26 + $0x28] sm:$0xff] %v1011_v4 }
 0x349   : > { %v1381_v5 = vpop.f32.mrb[16].mxu1 }
 0x34a   : > { %v1032_v6 = vadd.f32 %v1381_v5, %v1227_v43  ;;  %v1023_v7 = vpop.f32.mrb[17].mxu1 }
 0x34b   : > { %v1024_v8 = vadd.f32 %v1227_v43, %v1023_v7  ;;  %v1382_v9 = vpop.f32.mrb[18].mxu1 }
 0x34c   : > { %1064 = vst [vmem:[%s2098_s26 + $0x50] sm:$0xff] %v1032_v6  ;;  %v1035_v10 = vadd.f32 %v1382_v9, %v1227_v43  ;;  %v1026_v11 = vpop.f32.mrb[19].mxu1 }
 0x34d   : > { %1062 = vst [vmem:[%s2098_s26 + $0x40] sm:$0xff] %v1024_v8  ;;  %v1027_v12 = vadd.f32 %v1227_v43, %v1026_v11 }
 0x34e   : > { %1065 = vst [vmem:[%s2098_s26 + $0x58] sm:$0xff] %v1035_v10 }
 0x34f   : > { %1063 = vst [vmem:[%s2098_s26 + $0x48] sm:$0xff] %v1027_v12 }
 0x351   : > { %v1385_v13 = vpop.f32.mrb[20].mxu1 }
 0x352   : > { %v1048_v14 = vadd.f32 %v1385_v13, %v1227_v43  ;;  %v1039_v15 = vpop.f32.mrb[21].mxu1 }
 0x353   : > { %v1040_v16 = vadd.f32 %v1227_v43, %v1039_v15  ;;  %v1386_v17 = vpop.f32.mrb[22].mxu1 }
 0x354   : > { %1068 = vst [vmem:[%s2098_s26 + $0x70] sm:$0xff] %v1048_v14  ;;  %v1051_v18 = vadd.f32 %v1386_v17, %v1227_v43  ;;  %v1042_v19 = vpop.f32.mrb[23].mxu1 }
 0x355   : > { %1066 = vst [vmem:[%s2098_s26 + $0x60] sm:$0xff] %v1040_v16  ;;  %v1043_v20 = vadd.f32 %v1227_v43, %v1042_v19 }
 0x356   : > { %1069 = vst [vmem:[%s2098_s26 + $0x78] sm:$0xff] %v1051_v18 }
 0x357   : > { %1067 = vst [vmem:[%s2098_s26 + $0x68] sm:$0xff] %v1043_v20 }
 0x358   : > { %1643 = shalt.err (!%p1640_p4)
}
 0x359   : > { %s1644_s15 = scalar_lea.hbm %s2118_s25, 2048  ;;  %s1648_s17 = scalar_lea.hbm %s2175_s8, 4096 }
 0x35a   : > { %p1645_p9 = scmp.ne.s32.totalorder %s2118_s25, %s1644_s15  ;;  %p1649_p8 = scmp.lt.u32.totalorder %s2118_s25, %s2175_s8 }
 0x35b   : > { %p1650_p13 = scmp.lt.u32.totalorder %s1648_s17, %s1644_s15  ;;  %p1652_p10 = scmp.lt.u32.totalorder %s1644_s15, %s2118_s25 }
 0x35c   : > { %p1646_p0 = pnand %p1645_p9, %p1917_p5 }
 0x35d   : > { %p1651_p6 = por %p1650_p13, %p1649_p8 }
 0x35e   : > { %p1647_p11 = pneg %p1646_p0 }
 0x35f   : > { %p1653_p3 = por %p1652_p10, %p1651_p6 }
 0x361   : > { %p1654_p7 = pnand %p1653_p3, %p1647_p11 }
 0x363   : > { %1657 = shalt.err (!%p1654_p7)
}
 0x364   : > { %s1713_s28 = smov 128   ;;  %s1714_s16 = smov 8  }
 0x365   : > { %1417 = dma.vmem_to_hbm [thread:$0]  (%p1917_p5), %s2120_s11, 2048, %s2118_s25, %s1071_s7, %s1713_s28, %s1713_s28, %s1714_s16  }
 0x366 PF: > { %s2195_s12 = sld [smem:[#allocation16_spill]]  ;;  %s1099_s14 = sand.u32 1, %s1692_s29  }
 0x367   : > { %p2197_p1 = scmp.ge.s32.totalorder %s1704_s10, 2  ;;  %s1100_s18 = scalar_lea.sflag [#allocation5], %s1099_s14 }
 0x36c   : > { %p2196_p12 = scmp.ne.s32.totalorder %s2195_s12, 0 }
 0x36e   : > { %p1434_p2 = pnand %p2197_p1, %p2196_p12 }
 0x370   : > { %1687 = dma.done.wait (!%p1434_p2), %s1100_s18, 2048  }
 0x371   : > { %1689 = vsyncadd (!%p1434_p2), %s1100_s18, 4294965248  ;;  %p24_p4 = scmp.ge.s32.totalorder %s1903_s27, 4   ;;  %s2198_s29 = smov %s1696_s30 }
 0x372   : > { %s2199_s30 = smov %s1700_s9  ;;  %s2200_s9 = smov %s1913_s23 }
 0x373   : > { %s2201_s10 = smov %s1903_s27  ;;  %26 = sbr.rel (!%p24_p4) target bundleno = 9 (0x9), region = 109 }
 0x37a   :  { %1105 = vsyncpa [#allocation4], 1 }
 0x37b   :  { %1107 = vsyncpa [#allocation4 + $0x1], 1 }
 0x37c   :  { %1108 = vsyncpa [#allocation7], 1 }
 0x37d   :  { %1109 = vsyncpa [#allocation10], 1 }
 0x37e   :  { %1110 = vsyncpa [#allocation5], 1 }
 0x37f   :  { %1112 = vsyncpa [#allocation5 + $0x1], 1 }

</bundles_post_ra>
